<compile_context>
chip_gen: v5e
topology: v5e:2x2
jax: 0.10.0
libtpu: 0.0.40
codegen_flags: <defaults>
</compile_context>

<pallas_src>
import math

import jax
import jax.numpy as jnp
import numpy as np
from jax.experimental import pallas as pl
from jax.experimental.pallas import tpu as pltpu


# ---------------------------------------------------------------------------
# Pallas kernels
# ---------------------------------------------------------------------------
def convs_kernel(x_ref, w1_ref, b1_ref, w2_ref, b2_ref, o_ref):
    """conv1x1+BN+ReLU (C_in->C1) then conv1x1+BN+ReLU (C1->C2), channels-last.

    x_ref:  [TM, C_in]  bf16   (TM = tile_frames * HW rows; channels on lanes)
    w1_ref: [C_in, C1]  bf16   (resident)
    b1_ref: [1, C1]     f32
    w2_ref: [C1, C2]    bf16   (resident)
    b2_ref: [1, C2]     f32
    o_ref:  [TM, C2]    bf16
    """
    x = x_ref[...]
    h1 = jnp.dot(x, w1_ref[...], preferred_element_type=jnp.float32)      # [TM, C1]
    h1 = jnp.maximum(h1 + b1_ref[...], 0.0)
    h2 = jnp.dot(h1.astype(w2_ref.dtype), w2_ref[...],
                 preferred_element_type=jnp.float32)                      # [TM, C2]
    o_ref[...] = jnp.maximum(h2 + b2_ref[...], 0.0).astype(o_ref.dtype)


def linear_kernel(y_ref, w_ref, b_ref, o_ref):
    """out = flat @ W3t + b3 over a tile of rows (K = HW*C2 contraction)."""
    acc = jnp.dot(y_ref[...], w_ref[...], preferred_element_type=jnp.float32)
    o_ref[...] = acc + b_ref[...]


# ---------------------------------------------------------------------------
# Wrapper
# ---------------------------------------------------------------------------
def feature_flat_forward(x_nchw, folded, *, tile_frames=None, tile_rows_lin=None):
    N, C_in, H, W = x_nchw.shape
    HW = H * W

    w1t, b1 = folded["w1t"], folded["b1"]        # [C_in, C1] bf16, [1, C1] f32
    w2t, b2 = folded["w2t"], folded["b2"]        # [C1, C2]  bf16, [1, C2] f32
    w3t, b3 = folded["w3t"], folded["b3"]        # [K, O_pad] bf16, [1, O_pad] f32
    C1, C2 = w1t.shape[1], w2t.shape[1]
    K = C2 * HW
    O_pad = w3t.shape[1]
    O = folded["output_size"]
    assert w3t.shape[0] == K
    compute_dtype = w1t.dtype

    # ---- stage-1 tiling: tile_frames frames per grid step --------------------
    # Need (tf * HW) % 8 == 0 so the row tile is (8,128)-legal, and >= 2 grid
    # steps so both v7x TensorCores get work even at small N.
    step = 8 // math.gcd(HW, 8)
    if tile_frames is None:
        tile_frames = max(step, (min(16, max(1, N // 2)) // step) * step)
    tf = max(step, (tile_frames // step) * step)
    N_pad = ((N + tf - 1) // tf) * tf
    tile_m = tf * HW
    rows = N_pad * HW
    grid1 = rows // tile_m

    # Channels-last bf16 rows [N_pad*HW, C_in] in one fused XLA pass
    # (layout plumbing, not compute).  Padded frames produce ReLU(bias)
    # garbage that is sliced off at the very end.
    # TODO(synk): ideally the upstream backbone already emits bf16 / NHWC.
    if N_pad != N:
        x_nchw = jnp.pad(x_nchw, ((0, N_pad - N), (0, 0), (0, 0), (0, 0)))
    x_rows = jnp.transpose(x_nchw, (0, 2, 3, 1)).reshape(rows, C_in)
    x_rows = x_rows.astype(compute_dtype)

    conv_cost = pl.CostEstimate(
        flops=2 * rows * (C_in * C1 + C1 * C2),
        transcendentals=0,
        bytes_accessed=(2 * rows * C_in                 # bf16 x rows
                        + 2 * (C_in * C1 + C1 * C2)     # bf16 weights
                        + 4 * (C1 + C2)                 # f32 biases
                        + 2 * rows * C2))               # bf16 activation out

    h = pl.pallas_call(
        convs_kernel,
        out_shape=jax.ShapeDtypeStruct((rows, C2), jnp.bfloat16),
        grid=(grid1,),
        in_specs=[
            pl.BlockSpec((tile_m, C_in), lambda i: (i, 0)),   # row tile
            pl.BlockSpec((C_in, C1), lambda i: (0, 0)),       # resident
            pl.BlockSpec((1, C1), lambda i: (0, 0)),
            pl.BlockSpec((C1, C2), lambda i: (0, 0)),
            pl.BlockSpec((1, C2), lambda i: (0, 0)),
        ],
        out_specs=pl.BlockSpec((tile_m, C2), lambda i: (i, 0)),
        compiler_params=pltpu.CompilerParams(
            dimension_semantics=("parallel",)),
        cost_estimate=conv_cost,
    )(x_rows, w1t, b1, w2t, b2)

    # [N_pad*HW, C2] -> [N_pad, HW*C2]: pure metadata reshape (frame-aligned
    # padding); the (hw, c2) flatten order was folded into w3t in fold_params.
    flat = h.reshape(N_pad, K)

    # ---- stage 2: Linear(HW*C2 -> O_pad), tiled over rows --------------------
    if tile_rows_lin is None:
        tile_rows_lin = tf
    tb = N_pad                                   # fallback: single full block
    for cand in range(min(tile_rows_lin, N_pad), 0, -1):
        if N_pad % cand == 0 and (cand % 8 == 0 or cand == N_pad):
            tb = cand
            break
    grid2 = N_pad // tb

    lin_cost = pl.CostEstimate(
        flops=2 * N_pad * K * O_pad,
        transcendentals=0,
        bytes_accessed=2 * N_pad * K + 2 * K * O_pad + 4 * O_pad
                       + 4 * N_pad * O_pad)

    out = pl.pallas_call(
        linear_kernel,
        out_shape=jax.ShapeDtypeStruct((N_pad, O_pad), jnp.float32),
        grid=(grid2,),
        in_specs=[
            pl.BlockSpec((tb, K), lambda i: (i, 0)),
            pl.BlockSpec((K, O_pad), lambda i: (0, 0)),        # resident
            pl.BlockSpec((1, O_pad), lambda i: (0, 0)),
        ],
        out_specs=pl.BlockSpec((tb, O_pad), lambda i: (i, 0)),
        compiler_params=pltpu.CompilerParams(
            dimension_semantics=("parallel",)),
        cost_estimate=lin_cost,
    )(flat, w3t, b3)

    # single final slice: drop padded frames and lane padding of O.
    return out[:N, :O]


# ---------------------------------------------------------------------------
# Deterministic parameter construction (matches module __init__ shapes)
# ---------------------------------------------------------------------------
def make_raw_params(key, c_in, h, w, output_size):
    channels = [256, 64]                       # fixed by FeatureFlat
    k = jax.random.split(key, 6)
    return {
        # Conv2d(c_in, 256, 1): weight [256, c_in] (1x1 squeezed), bias [256]
        "w1": jax.random.normal(k[0], (channels[0], c_in), jnp.float32) * 0.05,
        "b1": jax.random.normal(k[1], (channels[0],), jnp.float32) * 0.05,
        # BatchNorm2d(256), fresh init
        "g1": jnp.ones((channels[0],), jnp.float32),
        "be1": jnp.zeros((channels[0],), jnp.float32),
        "rm1": jnp.zeros((channels[0],), jnp.float32),
        "rv1": jnp.ones((channels[0],), jnp.float32),
        # Conv2d(256, 64, 1)
        "w2": jax.random.normal(k[2], (channels[1], channels[0]), jnp.float32) * 0.05,
        "b2": jax.random.normal(k[3], (channels[1],), jnp.float32) * 0.05,
        # BatchNorm2d(64), fresh init
        "g2": jnp.ones((channels[1],), jnp.float32),
        "be2": jnp.zeros((channels[1],), jnp.float32),
        "rm2": jnp.zeros((channels[1],), jnp.float32),
        "rv2": jnp.ones((channels[1],), jnp.float32),
        # Linear(64*h*w, output_size)
        "w3": jax.random.normal(k[4], (output_size, channels[1] * h * w),
                                jnp.float32) * 0.02,
        "b3": jax.random.normal(k[5], (output_size,), jnp.float32) * 0.02,
    }


def fold_params(raw, h, w, compute_dtype=jnp.bfloat16):
    """Fold eval-mode BN into the convs, transpose weights for channels-last
    matmuls, permute + lane-pad the Linear weight, cast MXU weights to bf16."""
    eps = 1e-5
    C1 = raw["w1"].shape[0]
    C2 = raw["w2"].shape[0]
    HW = h * w
    O = raw["w3"].shape[0]

    s1 = raw["g1"] / jnp.sqrt(raw["rv1"] + eps)
    s2 = raw["g2"] / jnp.sqrt(raw["rv2"] + eps)

    w1t = (raw["w1"] * s1[:, None]).T.astype(compute_dtype)            # [C_in, C1]
    b1 = ((raw["b1"] - raw["rm1"]) * s1 + raw["be1"])[None, :]         # [1, C1] f32
    w2t = (raw["w2"] * s2[:, None]).T.astype(compute_dtype)            # [C1, C2]
    b2 = ((raw["b2"] - raw["rm2"]) * s2 + raw["be2"])[None, :]         # [1, C2] f32

    # PyTorch flattens per frame as (c2, h, w): k = c2*HW + hw.
    # The kernel produces (hw, c2): k = hw*C2 + c2.  Permute w3's columns once
    # so the kernel-side flatten is a free reshape.
    w3_perm = raw["w3"].reshape(O, C2, HW).transpose(0, 2, 1).reshape(O, C2 * HW)

    # Lane-dense stage-2 output: pad O up to a multiple of 128.
    O_pad = ((O + 127) // 128) * 128
    w3t = jnp.zeros((C2 * HW, O_pad), compute_dtype).at[:, :O].set(
        w3_perm.T.astype(compute_dtype))                               # [K, O_pad]
    b3 = jnp.zeros((1, O_pad), jnp.float32).at[0, :O].set(raw["b3"])   # [1, O_pad]

    return {"w1t": w1t, "b1": b1, "w2t": w2t, "b2": b2,
            "w3t": w3t, "b3": b3, "output_size": O}


# ---------------------------------------------------------------------------
# Pure-JAX reference (exact PyTorch forward semantics, eval-mode BN, f32)
# ---------------------------------------------------------------------------
def ref_forward(x_nchw, raw):
    eps = 1e-5

    def bn(y, g, be, rm, rv):
        return (y - rm[None, :, None, None]) / jnp.sqrt(rv[None, :, None, None] + eps) \
            * g[None, :, None, None] + be[None, :, None, None]

    y = jnp.einsum("bchw,oc->bohw", x_nchw, raw["w1"]) + raw["b1"][None, :, None, None]
    y = jnp.maximum(bn(y, raw["g1"], raw["be1"], raw["rm1"], raw["rv1"]), 0.0)
    y = jnp.einsum("bchw,oc->bohw", y, raw["w2"]) + raw["b2"][None, :, None, None]
    y = jnp.maximum(bn(y, raw["g2"], raw["be2"], raw["rm2"], raw["rv2"]), 0.0)
    flat = y.reshape(y.shape[0], -1)                    # (C, H, W) flatten order
    return flat @ raw["w3"].T + raw["b3"][None, :]


# ---------------------------------------------------------------------------
if __name__ == "__main__":
    # Small shapes consistent with FeatureFlat: frames [N, C_in, H, W]
    # (real model uses C_in=512, H=W=7; scaled down here, same structure).
    N, C_in, H, W = 16, 64, 7, 7        # e.g. batch=4, 4 timesteps flattened
    output_size = 32                    # args.demb (small)

    key = jax.random.PRNGKey(0)
    kx, kp = jax.random.split(key)
    x = jax.random.normal(kx, (N, C_in, H, W), jnp.float32)

    raw = make_raw_params(kp, C_in, H, W, output_size)
    folded = fold_params(raw, H, W)

    # tile_frames=8 -> stage-1 grid has 2 steps (2 TCs on v7x); tile_rows_lin=8
    # -> stage-2 grid has 2 steps as well.
    out = feature_flat_forward(x, folded, tile_frames=8, tile_rows_lin=8)
    out = jax.block_until_ready(out)

    expected = ref_forward(x, raw)
    # bf16 matmul inputs (f32 accumulation) -> loosened tolerance vs f32 ref.
    np.testing.assert_allclose(np.asarray(out), np.asarray(expected),
                               rtol=5e-2, atol=5e-2)
    print("KERNEL_OK")
</pallas_src>

<mosaic_0001>
module attributes {stable_mosaic.version = 11 : i64} {
  func.func @convs_kernel(%arg0: i32, %arg1: memref<392x64xbf16, #tpu.memory_space<vmem>>, %arg2: memref<64x256xbf16, #tpu.memory_space<vmem>>, %arg3: memref<1x256xf32, #tpu.memory_space<vmem>>, %arg4: memref<256x64xbf16, #tpu.memory_space<vmem>>, %arg5: memref<1x64xf32, #tpu.memory_space<vmem>>, %arg6: memref<392x64xbf16, #tpu.memory_space<vmem>>) attributes {dimension_semantics = [#tpu.dimension_semantics<parallel>], iteration_bounds = array<i64: 2>, scalar_prefetch = 0 : i64, scratch_operands = 0 : i64, tpu.core_type = #tpu.core_type<tc>, window_params = [{transform_indices = @transform_0, window_bounds = array<i64: 392, 64>}, {pipeline_mode = #tpu.pipeline_mode<synchronous>, transform_indices = @transform_1, window_bounds = array<i64: 64, 256>}, {pipeline_mode = #tpu.pipeline_mode<synchronous>, transform_indices = @transform_2, window_bounds = array<i64: 1, 256>}, {pipeline_mode = #tpu.pipeline_mode<synchronous>, transform_indices = @transform_3, window_bounds = array<i64: 256, 64>}, {pipeline_mode = #tpu.pipeline_mode<synchronous>, transform_indices = @transform_4, window_bounds = array<i64: 1, 64>}, {transform_indices = @transform_5, window_bounds = array<i64: 392, 64>}]} {
    %c0 = arith.constant 0 : index
    %c0_0 = arith.constant 0 : index
    %0 = vector.load %arg1[%c0, %c0_0] : memref<392x64xbf16, #tpu.memory_space<vmem>>, vector<392x64xbf16>
    %c0_1 = arith.constant 0 : index
    %c0_2 = arith.constant 0 : index
    %1 = vector.load %arg2[%c0_1, %c0_2] : memref<64x256xbf16, #tpu.memory_space<vmem>>, vector<64x256xbf16>
    %cst = arith.constant dense<0.000000e+00> : vector<392x256xf32>
    %2 = tpu.matmul %0, %1, %cst {dimension_numbers = #tpu.dot_dimension_numbers<[1], [0], [0], [1], [0, 0, 1, 1], [], []>} : vector<392x64xbf16>, vector<64x256xbf16>, vector<392x256xf32> -> vector<392x256xf32>
    %c0_3 = arith.constant 0 : index
    %c0_4 = arith.constant 0 : index
    %3 = vector.load %arg3[%c0_3, %c0_4] : memref<1x256xf32, #tpu.memory_space<vmem>>, vector<1x256xf32>
    %4 = vector.broadcast %3 : vector<1x256xf32> to vector<392x256xf32>
    %5 = arith.addf %2, %4 : vector<392x256xf32>
    %cst_5 = arith.constant 0.000000e+00 : f32
    %6 = vector.broadcast %cst_5 : f32 to vector<392x256xf32>
    %7 = arith.maximumf %5, %6 : vector<392x256xf32>
    %8 = arith.truncf %7 : vector<392x256xf32> to vector<392x256xbf16>
    %c0_6 = arith.constant 0 : index
    %c0_7 = arith.constant 0 : index
    %9 = vector.load %arg4[%c0_6, %c0_7] : memref<256x64xbf16, #tpu.memory_space<vmem>>, vector<256x64xbf16>
    %cst_8 = arith.constant dense<0.000000e+00> : vector<392x64xf32>
    %10 = tpu.matmul %8, %9, %cst_8 {dimension_numbers = #tpu.dot_dimension_numbers<[1], [0], [0], [1], [0, 0, 1, 1], [], []>} : vector<392x256xbf16>, vector<256x64xbf16>, vector<392x64xf32> -> vector<392x64xf32>
    %c0_9 = arith.constant 0 : index
    %c0_10 = arith.constant 0 : index
    %11 = vector.load %arg5[%c0_9, %c0_10] : memref<1x64xf32, #tpu.memory_space<vmem>>, vector<1x64xf32>
    %12 = vector.broadcast %11 : vector<1x64xf32> to vector<392x64xf32>
    %13 = arith.addf %10, %12 : vector<392x64xf32>
    %cst_11 = arith.constant 0.000000e+00 : f32
    %14 = vector.broadcast %cst_11 : f32 to vector<392x64xf32>
    %15 = arith.maximumf %13, %14 : vector<392x64xf32>
    %16 = arith.truncf %15 : vector<392x64xf32> to vector<392x64xbf16>
    %c0_12 = arith.constant 0 : index
    %c0_13 = arith.constant 0 : index
    %17 = vector.load %arg6[%c0_12, %c0_13] : memref<392x64xbf16, #tpu.memory_space<vmem>>, vector<392x64xbf16>
    tpu.vector_store %arg6[%c0_12, %c0_13], %16 {strides = array<i32>} : memref<392x64xbf16, #tpu.memory_space<vmem>>, vector<392x64xbf16>,
    return
  }
  func.func @transform_0(%arg0: i32) -> (i32, i32) {
    %c0_i32 = arith.constant 0 : i32
    %c0_i32_0 = arith.constant 0 : i32
    return %arg0, %c0_i32 : i32, i32
  }
  func.func @transform_1(%arg0: i32) -> (i32, i32) {
    %c0_i32 = arith.constant 0 : i32
    %c0_i32_0 = arith.constant 0 : i32
    %c0_i32_1 = arith.constant 0 : i32
    return %c0_i32, %c0_i32_0 : i32, i32
  }
  func.func @transform_2(%arg0: i32) -> (i32, i32) {
    %c0_i32 = arith.constant 0 : i32
    %c0_i32_0 = arith.constant 0 : i32
    %c0_i32_1 = arith.constant 0 : i32
    return %c0_i32, %c0_i32_0 : i32, i32
  }
  func.func @transform_3(%arg0: i32) -> (i32, i32) {
    %c0_i32 = arith.constant 0 : i32
    %c0_i32_0 = arith.constant 0 : i32
    %c0_i32_1 = arith.constant 0 : i32
    return %c0_i32, %c0_i32_0 : i32, i32
  }
  func.func @transform_4(%arg0: i32) -> (i32, i32) {
    %c0_i32 = arith.constant 0 : i32
    %c0_i32_0 = arith.constant 0 : i32
    %c0_i32_1 = arith.constant 0 : i32
    return %c0_i32, %c0_i32_0 : i32, i32
  }
  func.func @transform_5(%arg0: i32) -> (i32, i32) {
    %c0_i32 = arith.constant 0 : i32
    %c0_i32_0 = arith.constant 0 : i32
    return %arg0, %c0_i32 : i32, i32
  }
}

</mosaic_0001>

<bundles_post_ra>
// kernel: tpu_custom_call.1
= control target key start
LH: loop header
LB: loop body
LE: loop exit
PB: predicated region body
PF: predicated region fallthrough
CT: control target
= control target key end

     0   :  { %s1894_s18 = smov 0   ;;  %s2355_s0 = inlined_call_operand.vmem [shape: bf16[784,64], index: 0, kind: input, shape index: {}]   ;;  %s2356_s1 = inlined_call_operand.vmem [shape: bf16[64,256], index: 1, kind: input, shape index: {}]   ;;  %s2357_s2 = inlined_call_operand.vmem [shape: f32[1,256], index: 2, kind: input, shape index: {}]   ;;  %s2358_s3 = inlined_call_operand.vmem [shape: bf16[256,64], index: 3, kind: input, shape index: {}]   ;;  %s2359_s4 = inlined_call_operand.vmem [shape: f32[1,64], index: 4, kind: input, shape index: {}]   ;;  %s2360_s5 = inlined_call_operand.vmem [shape: bf16[784,64], index: 5, kind: output, shape index: {}]  }
   0x1 LB: > { %s1547_s19 = sadd.s32 4294967295, %s1862_s18   ;;  %p1551_p0 = scmp.ge.s32.totalorder %s1862_s18, 1  ;;  %s1862_s18 = sphi %s1894_s18, %s15_s18  }
   0x2   : > { %p188_p1 = scmp.lt.s32.totalorder %s1862_s18, 3 }
   0x4   : > { %p189_p2 = pnand %p1551_p0, %p188_p1 }
   0x5   : > { %s216_s21 = smul.u32 (!%p189_p2), 49, %s1547_s19 }
   0x6   : > { %192 = sbr.rel (%p189_p2) target bundleno = 694 (0x2b6), region = 40 }
   0x7   : > { %p217_p3 = scmp.lt.s32.totalorder (!%p189_p2), %s216_s21, 97 }
   0xb   : > { %v1676_v0 = vld [vmem:[%s2356_s1 + $0x30] sm:$0xf]  ;;  %v1829_v1 = vld [vmem:[%s2356_s1 + $0x34] sm:$0xf0]  ;;  %v1828_v2 = vld [vmem:[%s2356_s1 + $0x34] sm:$0xf] }
   0xc   : > { %v1677_v3 = vor.u32 %v1829_v1, %v1676_v0  ;;  %v1678_v4 = vld [vmem:[%s2356_s1 + $0x38] sm:$0xf0]  ;;  %v1668_v5 = vld [vmem:[%s2356_s1 + $0x20] sm:$0xf]  ;;  %v1827_v6 = vld [vmem:[%s2356_s1 + $0x24] sm:$0xf0] }
   0xd   : > { %v1681_v7 = vor.u32 %v1828_v2, %v1678_v4  ;;  %v1826_v8 = vld [vmem:[%s2356_s1 + $0x24] sm:$0xf]  ;;  %v1670_v9 = vld [vmem:[%s2356_s1 + $0x28] sm:$0xf0]  ;;  %v1669_v10 = vor.u32 %v1827_v6, %v1668_v5  ;;  %v1660_v12 = vld [vmem:[%s2356_s1 + $0x10] sm:$0xf] }
   0xe   : > { %535 = vmatpush.bf16.msra.mxu0 %v1677_v3  ;;  %v1673_v11 = vor.u32 %v1826_v8, %v1670_v9  ;;  %v1825_v13 = vld [vmem:[%s2356_s1 + $0x14] sm:$0xf0]  ;;  %v1824_v14 = vld [vmem:[%s2356_s1 + $0x14] sm:$0xf]  ;;  %v1662_v15 = vld [vmem:[%s2356_s1 + $0x18] sm:$0xf0] }
   0xf   : > { %668 = vmatpush.bf16.msra.mxu1 %v1681_v7  ;;  %v1661_v16 = vor.u32 %v1825_v13, %v1660_v12  ;;  %v1665_v17 = vor.u32 %v1824_v14, %v1662_v15  ;;  %v1652_v18 = vld [vmem:[%s2356_s1] sm:$0xf]  ;;  %v1823_v19 = vld [vmem:[%s2356_s1 + $0x4] sm:$0xf0]  ;;  %v1822_v20 = vld [vmem:[%s2356_s1 + $0x4] sm:$0xf] }
  0x10   : > { %v1654_v21 = vld [vmem:[%s2356_s1 + $0x8] sm:$0xf0]  ;;  %s2362_s21 = smov (!%p217_p3, %s216_s21), 97  ;;  %v1653_v22 = vor.u32 %v1823_v19, %v1652_v18  ;;  %vm455_vm0 = vcmask 523264   ;;  %v1837_v29 = vld [vmem:[%s2358_s3 + $0x38] sm:$0xff]  ;;  %v1836_v32 = vld [vmem:[%s2358_s3 + $0x30] sm:$0xff] }
  0x11   : > { %s1552_s19 = sshll.u32 %s2362_s21, 2  ;;  %v1657_v23 = vor.u32 %v1822_v20, %v1654_v21  ;;  %v1845_v30 = vld [vmem:[%s2358_s3 + $0x78] sm:$0xff]  ;;  %1077 = vmatpush.bf16.msra.mxu2 %v1837_v29  ;;  %v1844_v33 = vld [vmem:[%s2358_s3 + $0x70] sm:$0xff]  ;;  %v1835_v34 = vld [vmem:[%s2358_s3 + $0x28] sm:$0xff]  ;;  %vm1441_vm1 = vcmask 519168  }
  0x12   : > { %536 = vmatpush.bf16.msra.mxu0 %v1669_v10  ;;  %s1958_s7 = scalar_lea.vmem %s2355_s0, %s1552_s19  ;;  %1210 = vmatpush.bf16.msra.mxu3 %v1845_v30  ;;  %v1843_v35 = vld [vmem:[%s2358_s3 + $0x68] sm:$0xff]  ;;  %v1834_v36 = vld [vmem:[%s2358_s3 + $0x20] sm:$0xff]  ;;  %v1833_v39 = vld [vmem:[%s2358_s3 + $0x18] sm:$0xff]  ;;  %s2118_s28 = scalar_lea.vmem %s2360_s5, %s1552_s19 }
  0x13   : > { %669 = vmatpush.bf16.msra.mxu1 %v1673_v11  ;;  %v1798_v24 = vld [vmem:[%s1958_s7] sm:$0xff]  ;;  %v1799_v25 = vld [vmem:[%s1958_s7 + $0x8] sm:$0xff]  ;;  %v1800_v26 = vld [vmem:[%s1958_s7 + $0x10] sm:$0xff] }
  0x14   : > { %v1801_v27 = vld [vmem:[%s1958_s7 + $0x18] sm:$0xff]  ;;  %v1802_v28 = vld [vmem:[%s1958_s7 + $0x20] sm:$0xff]  ;;  %v1803_v31 = vld [vmem:[%s1958_s7 + $0x28] sm:$0xff] }
  0x15   : > { %1078 = vmatpush.bf16.msra.mxu2 %v1836_v32  ;;  %v1842_v37 = vld [vmem:[%s2358_s3 + $0x60] sm:$0xff]  ;;  %v1804_v38 = vld [vmem:[%s1958_s7 + $0x30] sm:$0xff]  ;;  %v1841_v40 = vld [vmem:[%s2358_s3 + $0x58] sm:$0xff] }
  0x16   : > { %537 = vmatpush.bf16.msra.mxu0 %v1661_v16  ;;  %1211 = vmatpush.bf16.msra.mxu3 %v1844_v33  ;;  %v1832_v41 = vld [vmem:[%s2358_s3 + $0x10] sm:$0xff]  ;;  %v1831_v43 = vld [vmem:[%s2358_s3 + $0x8] sm:$0xff]  ;;  %v1830_v45 = vld [vmem:[%s2358_s3] sm:$0xff] }
  0x17   : > { %670 = vmatpush.bf16.msra.mxu1 %v1665_v17  ;;  %v1840_v42 = vld [vmem:[%s2358_s3 + $0x50] sm:$0xff]  ;;  %v1839_v44 = vld [vmem:[%s2358_s3 + $0x48] sm:$0xff]  ;;  %v1838_v46 = vld [vmem:[%s2358_s3 + $0x40] sm:$0xff] }
  0x18   : > { %v1805_v47 = vld [vmem:[%s1958_s7 + $0x38] sm:$0xff]  ;;  %v1806_v48 = vld [vmem:[%s1958_s7 + $0x40] sm:$0xff]  ;;  %v1807_v2 = vld [vmem:[%s1958_s7 + $0x48] sm:$0xff] }
  0x19   : > { %1079 = vmatpush.bf16.msra.mxu2 %v1835_v34  ;;  %v286_v49 = vld [vmem:[%s2357_s2] sm:$0x3]  ;;  %v1808_v17 = vld [vmem:[%s1958_s7 + $0x50] sm:$0xff]  ;;  %v1809_v32 = vld [vmem:[%s1958_s7 + $0x58] sm:$0xff] }
  0x1a   : > { %538 = vmatpush.bf16.msra.mxu0 %v1653_v22  ;;  %1212 = vmatpush.bf16.msra.mxu3 %v1843_v35  ;;  %v2036_v52 = vperm.slane %v286_v49, 0  ;;  %v2039_v53 = vperm.slane %v286_v49, 1 }
  0x1b   : > { %671 = vmatpush.bf16.msra.mxu1 %v1657_v23 }
  0x1d   : > { %1682 = vmatmul.msk.bf16.vlgmr.msra.gmra.mxu0 %vm455_vm0, %v1798_v24  ;;  %1080 = vmatpush.bf16.msra.mxu2 %v1834_v36 }
  0x1e   : > { %1707 = vmatmul.msk.bf16.vlgmr.msra.gmra.mxu1 %vm455_vm0, %v1798_v24  ;;  %1213 = vmatpush.bf16.msra.mxu3 %v1842_v37 }
  0x21   : > { %1081 = vmatpush.bf16.msra.mxu2 %v1833_v39 }
  0x22   : > { %1214 = vmatpush.bf16.msra.mxu3 %v1841_v40 }
  0x25   : > { %1082 = vmatpush.bf16.msra.mxu2 %v1832_v41 }
  0x26   : > { %1215 = vmatpush.bf16.msra.mxu3 %v1840_v42 }
  0x29   : > { %1083 = vmatpush.bf16.msra.mxu2 %v1831_v43 }
  0x2a   : > { %1216 = vmatpush.bf16.msra.mxu3 %v1839_v44 }
  0x2d   : > { %1683 = vmatmul.msk.bf16.gmra.mxu0 %vm455_vm0, %v1799_v25  ;;  %1084 = vmatpush.bf16.msra.mxu2 %v1830_v45 }
  0x2e   : > { %1708 = vmatmul.msk.bf16.gmra.mxu1 %vm455_vm0, %v1799_v25  ;;  %1217 = vmatpush.bf16.msra.mxu3 %v1838_v46 }
  0x3d   : > { %1684 = vmatmul.msk.bf16.gmra.mxu0 %vm455_vm0, %v1800_v26 }
  0x3e   : > { %1709 = vmatmul.msk.bf16.gmra.mxu1 %vm455_vm0, %v1800_v26 }
  0x4d   : > { %1685 = vmatmul.msk.bf16.gmra.mxu0 %vm455_vm0, %v1801_v27 }
  0x4e   : > { %1710 = vmatmul.msk.bf16.gmra.mxu1 %vm455_vm0, %v1801_v27 }
  0x5d   : > { %1686 = vmatmul.msk.bf16.gmra.mxu0 %vm455_vm0, %v1802_v28 }
  0x5e   : > { %1711 = vmatmul.msk.bf16.gmra.mxu1 %vm455_vm0, %v1802_v28 }
  0x6d   : > { %1687 = vmatmul.msk.bf16.gmra.mxu0 %vm455_vm0, %v1803_v31 }
  0x6e   : > { %1712 = vmatmul.msk.bf16.gmra.mxu1 %vm455_vm0, %v1803_v31 }
  0x7d   : > { %1688 = vmatmul.msk.bf16.gmra.mxu0 %vm455_vm0, %v1804_v38 }
  0x7e   : > { %1713 = vmatmul.msk.bf16.gmra.mxu1 %vm455_vm0, %v1804_v38 }
  0x8d   : > { %1689 = vmatmul.msk.bf16.gmra.mxu0 %vm455_vm0, %v1805_v47 }
  0x8e   : > { %1714 = vmatmul.msk.bf16.gmra.mxu1 %vm455_vm0, %v1805_v47  ;;  %v1810_v47 = vld [vmem:[%s1958_s7 + $0x60] sm:$0xff] }
  0x9a   : > { %v540_v50 = vpop.f32.mrf.mxu0 }
  0x9b   : > { %v673_v51 = vpop.f32.mrf.mxu1  ;;  %v541_v54 = vadd.f32 %v540_v50, %v2036_v52 }
  0x9c   : > { %v674_v55 = vadd.f32 %v673_v51, %v2039_v53 }
  0x9d   : > { %1690 = vmatmul.msk.bf16.gmra.mxu0 %vm455_vm0, %v1806_v48  ;;  %v797_v60 = vmax.f32 %v541_v54, 0.0 }
  0x9e   : > { %1715 = vmatmul.msk.bf16.gmra.mxu1 %vm455_vm0, %v1806_v48  ;;  %v798_v62 = vmax.f32 %v674_v55, 0.0 }
  0xa2   : > { %v542_v56 = vpop.f32.mrf.mxu0 }
  0xa3   : > { %v543_v57 = vadd.f32 %v542_v56, %v2036_v52  ;;  %v675_v58 = vpop.f32.mrf.mxu1 }
  0xa4   : > { %v676_v59 = vadd.f32 %v675_v58, %v2039_v53 }
  0xa5   : > { %v799_v61 = vmax.f32 %v543_v57, 0.0 }
  0xa6   : > { %v800_v63 = vmax.f32 %v676_v59, 0.0 }
  0xa7   : > { %v895_v0 = vpack.c.bf16 %v799_v61, %v797_v60 }
  0xa8   : > { %v896_v1 = vpack.c.bf16 %v800_v63, %v798_v62 }
  0xa9   : > { %1085 = vmatmul.bf16.vlgmr.msra.gmra.mxu2 %v895_v0  ;;  %v1811_v0 = vld [vmem:[%s1958_s7 + $0x68] sm:$0xff] }
  0xaa   : > { %1218 = vmatmul.bf16.vlgmr.msra.gmra.mxu3 %v896_v1  ;;  %v545_v3 = vpop.f32.mrf.mxu0 }
  0xab   : > { %v678_v4 = vpop.f32.mrf.mxu1  ;;  %v546_v5 = vadd.f32 %v545_v3, %v2036_v52 }
  0xac   : > { %v679_v6 = vadd.f32 %v678_v4, %v2039_v53 }
  0xad   : > { %1691 = vmatmul.msk.bf16.gmra.mxu0 %vm455_vm0, %v1807_v2  ;;  %v801_v11 = vmax.f32 %v546_v5, 0.0 }
  0xae   : > { %1716 = vmatmul.msk.bf16.gmra.mxu1 %vm455_vm0, %v1807_v2  ;;  %v802_v13 = vmax.f32 %v679_v6, 0.0 }
  0xb2   : > { %v547_v7 = vpop.f32.mrf.mxu0 }
  0xb3   : > { %v548_v8 = vadd.f32 %v547_v7, %v2036_v52  ;;  %v680_v9 = vpop.f32.mrf.mxu1 }
  0xb4   : > { %v681_v10 = vadd.f32 %v680_v9, %v2039_v53 }
  0xb5   : > { %v803_v12 = vmax.f32 %v548_v8, 0.0 }
  0xb6   : > { %v804_v14 = vmax.f32 %v681_v10, 0.0 }
  0xb7   : > { %v897_v15 = vpack.c.bf16 %v803_v12, %v801_v11 }
  0xb8   : > { %v898_v16 = vpack.c.bf16 %v804_v14, %v802_v13 }
  0xb9   : > { %1090 = vmatmul.bf16.gmra.mxu2 %v897_v15  ;;  %v1812_v15 = vld [vmem:[%s1958_s7 + $0x70] sm:$0xff] }
  0xba   : > { %1223 = vmatmul.bf16.gmra.mxu3 %v898_v16  ;;  %v550_v18 = vpop.f32.mrf.mxu0 }
  0xbb   : > { %v683_v19 = vpop.f32.mrf.mxu1  ;;  %v551_v20 = vadd.f32 %v550_v18, %v2036_v52 }
  0xbc   : > { %v684_v21 = vadd.f32 %v683_v19, %v2039_v53 }
  0xbd   : > { %1692 = vmatmul.msk.bf16.gmra.mxu0 %vm455_vm0, %v1808_v17  ;;  %v805_v26 = vmax.f32 %v551_v20, 0.0 }
  0xbe   : > { %1717 = vmatmul.msk.bf16.gmra.mxu1 %vm455_vm0, %v1808_v17  ;;  %v806_v28 = vmax.f32 %v684_v21, 0.0 }
  0xc2   : > { %v552_v22 = vpop.f32.mrf.mxu0 }
  0xc3   : > { %v553_v23 = vadd.f32 %v552_v22, %v2036_v52  ;;  %v685_v24 = vpop.f32.mrf.mxu1 }
  0xc4   : > { %v686_v25 = vadd.f32 %v685_v24, %v2039_v53 }
  0xc5   : > { %v807_v27 = vmax.f32 %v553_v23, 0.0 }
  0xc6   : > { %v808_v29 = vmax.f32 %v686_v25, 0.0 }
  0xc7   : > { %v899_v30 = vpack.c.bf16 %v807_v27, %v805_v26 }
  0xc8   : > { %v900_v31 = vpack.c.bf16 %v808_v29, %v806_v28 }
  0xc9   : > { %1095 = vmatmul.bf16.gmra.mxu2 %v899_v30  ;;  %v1813_v30 = vld [vmem:[%s1958_s7 + $0x78] sm:$0xff] }
  0xca   : > { %1228 = vmatmul.bf16.gmra.mxu3 %v900_v31  ;;  %v555_v33 = vpop.f32.mrf.mxu0 }
  0xcb   : > { %v688_v34 = vpop.f32.mrf.mxu1  ;;  %v556_v35 = vadd.f32 %v555_v33, %v2036_v52 }
  0xcc   : > { %v689_v36 = vadd.f32 %v688_v34, %v2039_v53 }
  0xcd   : > { %1693 = vmatmul.msk.bf16.gmra.mxu0 %vm455_vm0, %v1809_v32  ;;  %v809_v41 = vmax.f32 %v556_v35, 0.0 }
  0xce   : > { %1718 = vmatmul.msk.bf16.gmra.mxu1 %vm455_vm0, %v1809_v32  ;;  %v810_v43 = vmax.f32 %v689_v36, 0.0 }
  0xd2   : > { %v557_v37 = vpop.f32.mrf.mxu0 }
  0xd3   : > { %v558_v38 = vadd.f32 %v557_v37, %v2036_v52  ;;  %v690_v39 = vpop.f32.mrf.mxu1 }
  0xd4   : > { %v691_v40 = vadd.f32 %v690_v39, %v2039_v53 }
  0xd5   : > { %v811_v42 = vmax.f32 %v558_v38, 0.0 }
  0xd6   : > { %v812_v44 = vmax.f32 %v691_v40, 0.0 }
  0xd7   : > { %v901_v45 = vpack.c.bf16 %v811_v42, %v809_v41 }
  0xd8   : > { %v902_v46 = vpack.c.bf16 %v812_v44, %v810_v43 }
  0xd9   : > { %1100 = vmatmul.bf16.gmra.mxu2 %v901_v45  ;;  %v1814_v45 = vld [vmem:[%s1958_s7 + $0x80] sm:$0xff] }
  0xda   : > { %1233 = vmatmul.bf16.gmra.mxu3 %v902_v46  ;;  %v560_v48 = vpop.f32.mrf.mxu0 }
  0xdb   : > { %v693_v49 = vpop.f32.mrf.mxu1  ;;  %v561_v50 = vadd.f32 %v560_v48, %v2036_v52 }
  0xdc   : > { %v694_v51 = vadd.f32 %v693_v49, %v2039_v53 }
  0xdd   : > { %1694 = vmatmul.msk.bf16.gmra.mxu0 %vm455_vm0, %v1810_v47  ;;  %v813_v58 = vmax.f32 %v561_v50, 0.0 }
  0xde   : > { %1719 = vmatmul.msk.bf16.gmra.mxu1 %vm455_vm0, %v1810_v47  ;;  %v814_v60 = vmax.f32 %v694_v51, 0.0 }
  0xe2   : > { %v562_v54 = vpop.f32.mrf.mxu0 }
  0xe3   : > { %v563_v55 = vadd.f32 %v562_v54, %v2036_v52  ;;  %v695_v56 = vpop.f32.mrf.mxu1 }
  0xe4   : > { %v696_v57 = vadd.f32 %v695_v56, %v2039_v53 }
  0xe5   : > { %v815_v59 = vmax.f32 %v563_v55, 0.0 }
  0xe6   : > { %v816_v61 = vmax.f32 %v696_v57, 0.0 }
  0xe7   : > { %v903_v62 = vpack.c.bf16 %v815_v59, %v813_v58 }
  0xe8   : > { %v904_v63 = vpack.c.bf16 %v816_v61, %v814_v60 }
  0xe9   : > { %1105 = vmatmul.bf16.gmra.mxu2 %v903_v62  ;;  %v2105_v62 = vld [vmem:[%s2359_s4] ss:$0 sm:$0xff] }
  0xea   : > { %1238 = vmatmul.bf16.gmra.mxu3 %v904_v63  ;;  %v565_v1 = vpop.f32.mrf.mxu0  ;;  %v1815_v63 = vld [vmem:[%s1958_s7 + $0x88] sm:$0xff] }
  0xeb   : > { %v698_v2 = vpop.f32.mrf.mxu1  ;;  %v566_v3 = vadd.f32 %v565_v1, %v2036_v52 }
  0xec   : > { %v699_v4 = vadd.f32 %v698_v2, %v2039_v53 }
  0xed   : > { %1695 = vmatmul.msk.bf16.gmra.mxu0 %vm455_vm0, %v1811_v0  ;;  %v817_v9 = vmax.f32 %v566_v3, 0.0 }
  0xee   : > { %1720 = vmatmul.msk.bf16.gmra.mxu1 %vm455_vm0, %v1811_v0  ;;  %v818_v11 = vmax.f32 %v699_v4, 0.0 }
  0xf2   : > { %v567_v5 = vpop.f32.mrf.mxu0 }
  0xf3   : > { %v568_v6 = vadd.f32 %v567_v5, %v2036_v52  ;;  %v700_v7 = vpop.f32.mrf.mxu1 }
  0xf4   : > { %v701_v8 = vadd.f32 %v700_v7, %v2039_v53 }
  0xf5   : > { %v819_v10 = vmax.f32 %v568_v6, 0.0 }
  0xf6   : > { %v820_v12 = vmax.f32 %v701_v8, 0.0 }
  0xf7   : > { %v905_v13 = vpack.c.bf16 %v819_v10, %v817_v9 }
  0xf8   : > { %v906_v14 = vpack.c.bf16 %v820_v12, %v818_v11 }
  0xf9   : > { %1110 = vmatmul.bf16.gmra.mxu2 %v905_v13 }
  0xfa   : > { %1243 = vmatmul.bf16.gmra.mxu3 %v906_v14  ;;  %v570_v16 = vpop.f32.mrf.mxu0 }
  0xfb   : > { %v703_v17 = vpop.f32.mrf.mxu1  ;;  %v571_v18 = vadd.f32 %v570_v16, %v2036_v52 }
  0xfc   : > { %v704_v19 = vadd.f32 %v703_v17, %v2039_v53 }
  0xfd   : > { %1696 = vmatmul.msk.bf16.gmra.mxu0 %vm455_vm0, %v1812_v15  ;;  %v821_v24 = vmax.f32 %v571_v18, 0.0 }
  0xfe   : > { %1721 = vmatmul.msk.bf16.gmra.mxu1 %vm455_vm0, %v1812_v15  ;;  %v822_v26 = vmax.f32 %v704_v19, 0.0 }
 0x102   : > { %v572_v20 = vpop.f32.mrf.mxu0 }
 0x103   : > { %v573_v21 = vadd.f32 %v572_v20, %v2036_v52  ;;  %v705_v22 = vpop.f32.mrf.mxu1 }
 0x104   : > { %v706_v23 = vadd.f32 %v705_v22, %v2039_v53 }
 0x105   : > { %v823_v25 = vmax.f32 %v573_v21, 0.0 }
 0x106   : > { %v824_v27 = vmax.f32 %v706_v23, 0.0 }
 0x107   : > { %v907_v28 = vpack.c.bf16 %v823_v25, %v821_v24  ;;  %v1816_v25 = vld [vmem:[%s1958_s7 + $0x90] sm:$0xff] }
 0x108   : > { %v908_v29 = vpack.c.bf16 %v824_v27, %v822_v26 }
 0x109   : > { %1115 = vmatmul.bf16.gmra.mxu2 %v907_v28 }
 0x10a   : > { %1248 = vmatmul.bf16.gmra.mxu3 %v908_v29  ;;  %v575_v31 = vpop.f32.mrf.mxu0 }
 0x10b   : > { %v708_v32 = vpop.f32.mrf.mxu1  ;;  %v576_v33 = vadd.f32 %v575_v31, %v2036_v52 }
 0x10c   : > { %v709_v34 = vadd.f32 %v708_v32, %v2039_v53 }
 0x10d   : > { %1697 = vmatmul.msk.bf16.gmra.mxu0 %vm455_vm0, %v1813_v30  ;;  %v825_v39 = vmax.f32 %v576_v33, 0.0 }
 0x10e   : > { %1722 = vmatmul.msk.bf16.gmra.mxu1 %vm455_vm0, %v1813_v30  ;;  %v826_v41 = vmax.f32 %v709_v34, 0.0 }
 0x112   : > { %v577_v35 = vpop.f32.mrf.mxu0 }
 0x113   : > { %v578_v36 = vadd.f32 %v577_v35, %v2036_v52  ;;  %v710_v37 = vpop.f32.mrf.mxu1 }
 0x114   : > { %v711_v38 = vadd.f32 %v710_v37, %v2039_v53 }
 0x115   : > { %v827_v40 = vmax.f32 %v578_v36, 0.0 }
 0x116   : > { %v828_v42 = vmax.f32 %v711_v38, 0.0 }
 0x117   : > { %v909_v43 = vpack.c.bf16 %v827_v40, %v825_v39 }
 0x118   : > { %v910_v44 = vpack.c.bf16 %v828_v42, %v826_v41 }
 0x119   : > { %1120 = vmatmul.bf16.gmra.mxu2 %v909_v43 }
 0x11a   : > { %1253 = vmatmul.bf16.gmra.mxu3 %v910_v44  ;;  %v580_v46 = vpop.f32.mrf.mxu0 }
 0x11b   : > { %v713_v47 = vpop.f32.mrf.mxu1  ;;  %v581_v48 = vadd.f32 %v580_v46, %v2036_v52 }
 0x11c   : > { %v714_v49 = vadd.f32 %v713_v47, %v2039_v53 }
 0x11d   : > { %1698 = vmatmul.msk.bf16.gmra.mxu0 %vm455_vm0, %v1814_v45  ;;  %v829_v56 = vmax.f32 %v581_v48, 0.0 }
 0x11e   : > { %1723 = vmatmul.msk.bf16.gmra.mxu1 %vm455_vm0, %v1814_v45  ;;  %v830_v58 = vmax.f32 %v714_v49, 0.0 }
 0x122   : > { %v582_v50 = vpop.f32.mrf.mxu0 }
 0x123   : > { %v583_v51 = vadd.f32 %v582_v50, %v2036_v52  ;;  %v715_v54 = vpop.f32.mrf.mxu1 }
 0x124   : > { %v716_v55 = vadd.f32 %v715_v54, %v2039_v53  ;;  %v1817_v54 = vld [vmem:[%s1958_s7 + $0x98] sm:$0xff] }
 0x125   : > { %v831_v57 = vmax.f32 %v583_v51, 0.0 }
 0x126   : > { %v832_v59 = vmax.f32 %v716_v55, 0.0 }
 0x127   : > { %v911_v60 = vpack.c.bf16 %v831_v57, %v829_v56 }
 0x128   : > { %v912_v61 = vpack.c.bf16 %v832_v59, %v830_v58 }
 0x129   : > { %1125 = vmatmul.bf16.gmra.mxu2 %v911_v60 }
 0x12a   : > { %1258 = vmatmul.bf16.gmra.mxu3 %v912_v61  ;;  %v585_v0 = vpop.f32.mrf.mxu0 }
 0x12b   : > { %v718_v1 = vpop.f32.mrf.mxu1  ;;  %v586_v6 = vadd.f32 %v585_v0, %v2036_v52 }
 0x12c   : > { %v1086_v2 = vpop.f32.mrf.mxu2  ;;  %v719_v8 = vadd.f32 %v718_v1, %v2039_v53 }
 0x12d   : > { %v1087_v3 = vadd.f32 %v2105_v62, %v1086_v2  ;;  %v1219_v4 = vpop.f32.mrf.mxu3  ;;  %1699 = vmatmul.msk.bf16.gmra.mxu0 %vm455_vm0, %v1815_v63  ;;  %v833_v15 = vmax.f32 %v586_v6, 0.0 }
 0x12e   : > { %1724 = vmatmul.msk.bf16.gmra.mxu1 %vm455_vm0, %v1815_v63  ;;  %v834_v19 = vmax.f32 %v719_v8, 0.0 }
 0x12f   : > { %v1220_v5 = vadd.f32 %v1219_v4, %v1087_v3 }
 0x131   : > { %v1343_v7 = vmax.f32 %v1220_v5, 0.0 }
 0x132   : > { %v587_v9 = vpop.f32.mrf.mxu0 }
 0x133   : > { %v1392_v10 = vpack.c.bf16 %v1343_v7, %v1343_v7  ;;  %v588_v11 = vadd.f32 %v587_v9, %v2036_v52  ;;  %v720_v12 = vpop.f32.mrf.mxu1 }
 0x134   : > { %v721_v13 = vadd.f32 %v720_v12, %v2039_v53  ;;  %v1088_v14 = vpop.f32.mrf.mxu2 }
 0x135   : > { %1442 = vst.msk [vmem:[%s2118_s28] sm:$0xf] %vm1441_vm1, %v1392_v10  ;;  %v835_v16 = vmax.f32 %v588_v11, 0.0  ;;  %v1089_v17 = vadd.f32 %v2105_v62, %v1088_v14  ;;  %v1221_v18 = vpop.f32.mrf.mxu3 }
 0x136   : > { %v836_v20 = vmax.f32 %v721_v13, 0.0 }
 0x137   : > { %v1222_v21 = vadd.f32 %v1221_v18, %v1089_v17  ;;  %v913_v22 = vpack.c.bf16 %v835_v16, %v833_v15  ;;  %v1818_v18 = vld [vmem:[%s1958_s7 + $0xa0] sm:$0xff] }
 0x138   : > { %v914_v23 = vpack.c.bf16 %v836_v20, %v834_v19 }
 0x139   : > { %v1344_v24 = vmax.f32 %v1222_v21, 0.0  ;;  %1130 = vmatmul.bf16.gmra.mxu2 %v913_v22 }
 0x13a   : > { %1263 = vmatmul.bf16.gmra.mxu3 %v914_v23  ;;  %v590_v26 = vpop.f32.mrf.mxu0 }
 0x13b   : > { %v1393_v27 = vpack.c.bf16 %v1344_v24, %v1344_v24  ;;  %v723_v28 = vpop.f32.mrf.mxu1  ;;  %v591_v33 = vadd.f32 %v590_v26, %v2036_v52 }
 0x13c   : > { %v1091_v29 = vpop.f32.mrf.mxu2  ;;  %v724_v35 = vadd.f32 %v723_v28, %v2039_v53 }
 0x13d   : > { %1443 = vst.msk [vmem:[%s2118_s28 + $0x4] sm:$0xf] %vm1441_vm1, %v1393_v27  ;;  %v1092_v30 = vadd.f32 %v2105_v62, %v1091_v29  ;;  %v1224_v31 = vpop.f32.mrf.mxu3  ;;  %1700 = vmatmul.msk.bf16.gmra.mxu0 %vm455_vm0, %v1816_v25  ;;  %v837_v42 = vmax.f32 %v591_v33, 0.0 }
 0x13e   : > { %1725 = vmatmul.msk.bf16.gmra.mxu1 %vm455_vm0, %v1816_v25  ;;  %v838_v46 = vmax.f32 %v724_v35, 0.0 }
 0x13f   : > { %v1225_v32 = vadd.f32 %v1224_v31, %v1092_v30 }
 0x141   : > { %v1345_v34 = vmax.f32 %v1225_v32, 0.0 }
 0x142   : > { %v592_v36 = vpop.f32.mrf.mxu0 }
 0x143   : > { %v1394_v37 = vpack.c.bf16 %v1345_v34, %v1345_v34  ;;  %v593_v38 = vadd.f32 %v592_v36, %v2036_v52  ;;  %v725_v39 = vpop.f32.mrf.mxu1 }
 0x144   : > { %v726_v40 = vadd.f32 %v725_v39, %v2039_v53  ;;  %v1093_v41 = vpop.f32.mrf.mxu2 }
 0x145   : > { %1444 = vst.msk [vmem:[%s2118_s28 + $0x8] sm:$0xf] %vm1441_vm1, %v1394_v37  ;;  %v839_v43 = vmax.f32 %v593_v38, 0.0  ;;  %v1094_v44 = vadd.f32 %v2105_v62, %v1093_v41  ;;  %v1226_v45 = vpop.f32.mrf.mxu3 }
 0x146   : > { %v840_v47 = vmax.f32 %v726_v40, 0.0 }
 0x147   : > { %v1227_v48 = vadd.f32 %v1226_v45, %v1094_v44  ;;  %v915_v49 = vpack.c.bf16 %v839_v43, %v837_v42  ;;  %v1819_v45 = vld [vmem:[%s1958_s7 + $0xa8] sm:$0xff] }
 0x148   : > { %v916_v50 = vpack.c.bf16 %v840_v47, %v838_v46 }
 0x149   : > { %v1346_v51 = vmax.f32 %v1227_v48, 0.0  ;;  %1135 = vmatmul.bf16.gmra.mxu2 %v915_v49 }
 0x14a   : > { %1268 = vmatmul.bf16.gmra.mxu3 %v916_v50  ;;  %v595_v55 = vpop.f32.mrf.mxu0 }
 0x14b   : > { %v1395_v56 = vpack.c.bf16 %v1346_v51, %v1346_v51  ;;  %v728_v57 = vpop.f32.mrf.mxu1  ;;  %v596_v63 = vadd.f32 %v595_v55, %v2036_v52 }
 0x14c   : > { %v1096_v58 = vpop.f32.mrf.mxu2  ;;  %v729_v1 = vadd.f32 %v728_v57, %v2039_v53 }
 0x14d   : > { %1445 = vst.msk [vmem:[%s2118_s28 + $0xc] sm:$0xf] %vm1441_vm1, %v1395_v56  ;;  %v1097_v59 = vadd.f32 %v2105_v62, %v1096_v58  ;;  %v1229_v60 = vpop.f32.mrf.mxu3  ;;  %1701 = vmatmul.msk.bf16.gmra.mxu0 %vm455_vm0, %v1817_v54  ;;  %v841_v8 = vmax.f32 %v596_v63, 0.0 }
 0x14e   : > { %1726 = vmatmul.msk.bf16.gmra.mxu1 %vm455_vm0, %v1817_v54  ;;  %v842_v12 = vmax.f32 %v729_v1, 0.0 }
 0x14f   : > { %v1230_v61 = vadd.f32 %v1229_v60, %v1097_v59 }
 0x151   : > { %v1347_v0 = vmax.f32 %v1230_v61, 0.0 }
 0x152   : > { %v597_v2 = vpop.f32.mrf.mxu0 }
 0x153   : > { %v1396_v3 = vpack.c.bf16 %v1347_v0, %v1347_v0  ;;  %v598_v4 = vadd.f32 %v597_v2, %v2036_v52  ;;  %v730_v5 = vpop.f32.mrf.mxu1 }
 0x154   : > { %v731_v6 = vadd.f32 %v730_v5, %v2039_v53  ;;  %v1098_v7 = vpop.f32.mrf.mxu2 }
 0x155   : > { %1446 = vst.msk [vmem:[%s2118_s28 + $0x10] sm:$0xf] %vm1441_vm1, %v1396_v3  ;;  %v843_v9 = vmax.f32 %v598_v4, 0.0  ;;  %v1099_v10 = vadd.f32 %v2105_v62, %v1098_v7  ;;  %v1231_v11 = vpop.f32.mrf.mxu3 }
 0x156   : > { %v844_v13 = vmax.f32 %v731_v6, 0.0 }
 0x157   : > { %v1232_v14 = vadd.f32 %v1231_v11, %v1099_v10  ;;  %v917_v15 = vpack.c.bf16 %v843_v9, %v841_v8  ;;  %v1820_v11 = vld [vmem:[%s1958_s7 + $0xb0] sm:$0xff] }
 0x158   : > { %v918_v16 = vpack.c.bf16 %v844_v13, %v842_v12 }
 0x159   : > { %v1348_v17 = vmax.f32 %v1232_v14, 0.0  ;;  %1140 = vmatmul.bf16.gmra.mxu2 %v917_v15 }
 0x15a   : > { %1273 = vmatmul.bf16.gmra.mxu3 %v918_v16  ;;  %v600_v19 = vpop.f32.mrf.mxu0 }
 0x15b   : > { %v1397_v20 = vpack.c.bf16 %v1348_v17, %v1348_v17  ;;  %v733_v21 = vpop.f32.mrf.mxu1  ;;  %v601_v26 = vadd.f32 %v600_v19, %v2036_v52 }
 0x15c   : > { %v1101_v22 = vpop.f32.mrf.mxu2  ;;  %v734_v28 = vadd.f32 %v733_v21, %v2039_v53 }
 0x15d   : > { %1447 = vst.msk [vmem:[%s2118_s28 + $0x14] sm:$0xf] %vm1441_vm1, %v1397_v20  ;;  %v1102_v23 = vadd.f32 %v2105_v62, %v1101_v22  ;;  %v1234_v24 = vpop.f32.mrf.mxu3  ;;  %1702 = vmatmul.msk.bf16.gmra.mxu0 %vm455_vm0, %v1818_v18  ;;  %v845_v35 = vmax.f32 %v601_v26, 0.0 }
 0x15e   : > { %1727 = vmatmul.msk.bf16.gmra.mxu1 %vm455_vm0, %v1818_v18  ;;  %v846_v39 = vmax.f32 %v734_v28, 0.0 }
 0x15f   : > { %v1235_v25 = vadd.f32 %v1234_v24, %v1102_v23 }
 0x161   : > { %v1349_v27 = vmax.f32 %v1235_v25, 0.0 }
 0x162   : > { %v602_v29 = vpop.f32.mrf.mxu0 }
 0x163   : > { %v1398_v30 = vpack.c.bf16 %v1349_v27, %v1349_v27  ;;  %v603_v31 = vadd.f32 %v602_v29, %v2036_v52  ;;  %v735_v32 = vpop.f32.mrf.mxu1 }
 0x164   : > { %v736_v33 = vadd.f32 %v735_v32, %v2039_v53  ;;  %v1103_v34 = vpop.f32.mrf.mxu2 }
 0x165   : > { %1448 = vst.msk [vmem:[%s2118_s28 + $0x18] sm:$0xf] %vm1441_vm1, %v1398_v30  ;;  %v847_v36 = vmax.f32 %v603_v31, 0.0  ;;  %v1104_v37 = vadd.f32 %v2105_v62, %v1103_v34  ;;  %v1236_v38 = vpop.f32.mrf.mxu3 }
 0x166   : > { %v848_v40 = vmax.f32 %v736_v33, 0.0 }
 0x167   : > { %v1237_v41 = vadd.f32 %v1236_v38, %v1104_v37  ;;  %v919_v42 = vpack.c.bf16 %v847_v36, %v845_v35  ;;  %v1821_v38 = vld [vmem:[%s1958_s7 + $0xb8] sm:$0xff] }
 0x168   : > { %v920_v43 = vpack.c.bf16 %v848_v40, %v846_v39 }
 0x169   : > { %v1350_v44 = vmax.f32 %v1237_v41, 0.0  ;;  %1145 = vmatmul.bf16.gmra.mxu2 %v919_v42 }
 0x16a   : > { %1278 = vmatmul.bf16.gmra.mxu3 %v920_v43  ;;  %v605_v46 = vpop.f32.mrf.mxu0 }
 0x16b   : > { %v1399_v47 = vpack.c.bf16 %v1350_v44, %v1350_v44  ;;  %v738_v48 = vpop.f32.mrf.mxu1  ;;  %v606_v55 = vadd.f32 %v605_v46, %v2036_v52 }
 0x16c   : > { %v1106_v49 = vpop.f32.mrf.mxu2  ;;  %v739_v57 = vadd.f32 %v738_v48, %v2039_v53 }
 0x16d   : > { %1449 = vst.msk [vmem:[%s2118_s28 + $0x1c] sm:$0xf] %vm1441_vm1, %v1399_v47  ;;  %v1107_v50 = vadd.f32 %v2105_v62, %v1106_v49  ;;  %v1239_v51 = vpop.f32.mrf.mxu3  ;;  %1703 = vmatmul.msk.bf16.gmra.mxu0 %vm455_vm0, %v1819_v45  ;;  %v849_v1 = vmax.f32 %v606_v55, 0.0 }
 0x16e   : > { %1728 = vmatmul.msk.bf16.gmra.mxu1 %vm455_vm0, %v1819_v45  ;;  %v850_v5 = vmax.f32 %v739_v57, 0.0 }
 0x16f   : > { %v1240_v54 = vadd.f32 %v1239_v51, %v1107_v50  ;;  %v277_v50 = vld [vmem:[%s1958_s7 + $0xc0] sm:$0xf] }
 0x171   : > { %v1351_v56 = vmax.f32 %v1240_v54, 0.0 }
 0x172   : > { %v607_v58 = vpop.f32.mrf.mxu0 }
 0x173   : > { %v1400_v59 = vpack.c.bf16 %v1351_v56, %v1351_v56  ;;  %v608_v60 = vadd.f32 %v607_v58, %v2036_v52  ;;  %v740_v61 = vpop.f32.mrf.mxu1 }
 0x174   : > { %v741_v63 = vadd.f32 %v740_v61, %v2039_v53  ;;  %v1108_v0 = vpop.f32.mrf.mxu2 }
 0x175   : > { %1450 = vst.msk [vmem:[%s2118_s28 + $0x20] sm:$0xf] %vm1441_vm1, %v1400_v59  ;;  %v851_v2 = vmax.f32 %v608_v60, 0.0  ;;  %v1109_v3 = vadd.f32 %v2105_v62, %v1108_v0  ;;  %v1241_v4 = vpop.f32.mrf.mxu3 }
 0x176   : > { %v852_v6 = vmax.f32 %v741_v63, 0.0  ;;  %v389_v63 = vunpack.c.l.b16 %v277_v50 }
 0x177   : > { %v921_v7 = vpack.c.bf16 %v851_v2, %v849_v1  ;;  %v1242_v8 = vadd.f32 %v1241_v4, %v1109_v3 }
 0x178   : > { %v922_v9 = vpack.c.bf16 %v852_v6, %v850_v5  ;;  %v414_v6 = vpack.c.b16 %v389_v63, %v389_v63 }
 0x179   : > { %v1352_v10 = vmax.f32 %v1242_v8, 0.0  ;;  %1150 = vmatmul.bf16.gmra.mxu2 %v921_v7 }
 0x17a   : > { %1283 = vmatmul.bf16.gmra.mxu3 %v922_v9  ;;  %v610_v12 = vpop.f32.mrf.mxu0 }
 0x17b   : > { %v1401_v13 = vpack.c.bf16 %v1352_v10, %v1352_v10  ;;  %v743_v14 = vpop.f32.mrf.mxu1  ;;  %v611_v19 = vadd.f32 %v610_v12, %v2036_v52 }
 0x17c   : > { %v1111_v15 = vpop.f32.mrf.mxu2  ;;  %v744_v21 = vadd.f32 %v743_v14, %v2039_v53 }
 0x17d   : > { %1451 = vst.msk [vmem:[%s2118_s28 + $0x24] sm:$0xf] %vm1441_vm1, %v1401_v13  ;;  %v1112_v16 = vadd.f32 %v2105_v62, %v1111_v15  ;;  %v1244_v17 = vpop.f32.mrf.mxu3  ;;  %1704 = vmatmul.msk.bf16.gmra.mxu0 %vm455_vm0, %v1820_v11  ;;  %v853_v28 = vmax.f32 %v611_v19, 0.0 }
 0x17e   : > { %1729 = vmatmul.msk.bf16.gmra.mxu1 %vm455_vm0, %v1820_v11  ;;  %v854_v32 = vmax.f32 %v744_v21, 0.0 }
 0x17f   : > { %v1245_v18 = vadd.f32 %v1244_v17, %v1112_v16 }
 0x181   : > { %v1353_v20 = vmax.f32 %v1245_v18, 0.0 }
 0x182   : > { %v612_v22 = vpop.f32.mrf.mxu0 }
 0x183   : > { %v1402_v23 = vpack.c.bf16 %v1353_v20, %v1353_v20  ;;  %v613_v24 = vadd.f32 %v612_v22, %v2036_v52  ;;  %v745_v25 = vpop.f32.mrf.mxu1 }
 0x184   : > { %v746_v26 = vadd.f32 %v745_v25, %v2039_v53  ;;  %v1113_v27 = vpop.f32.mrf.mxu2 }
 0x185   : > { %1452 = vst.msk [vmem:[%s2118_s28 + $0x28] sm:$0xf] %vm1441_vm1, %v1402_v23  ;;  %v855_v29 = vmax.f32 %v613_v24, 0.0  ;;  %v1114_v30 = vadd.f32 %v2105_v62, %v1113_v27  ;;  %v1246_v31 = vpop.f32.mrf.mxu3 }
 0x186   : > { %v856_v33 = vmax.f32 %v746_v26, 0.0 }
 0x187   : > { %v923_v34 = vpack.c.bf16 %v855_v29, %v853_v28  ;;  %v1247_v35 = vadd.f32 %v1246_v31, %v1114_v30 }
 0x188   : > { %v924_v36 = vpack.c.bf16 %v856_v33, %v854_v32 }
 0x189   : > { %v1354_v37 = vmax.f32 %v1247_v35, 0.0  ;;  %1155 = vmatmul.bf16.gmra.mxu2 %v923_v34 }
 0x18a   : > { %1288 = vmatmul.bf16.gmra.mxu3 %v924_v36  ;;  %v615_v39 = vpop.f32.mrf.mxu0 }
 0x18b   : > { %v1403_v40 = vpack.c.bf16 %v1354_v37, %v1354_v37  ;;  %v748_v41 = vpop.f32.mrf.mxu1  ;;  %v616_v46 = vadd.f32 %v615_v39, %v2036_v52 }
 0x18c   : > { %v1116_v42 = vpop.f32.mrf.mxu2  ;;  %v749_v48 = vadd.f32 %v748_v41, %v2039_v53 }
 0x18d   : > { %1453 = vst.msk [vmem:[%s2118_s28 + $0x2c] sm:$0xf] %vm1441_vm1, %v1403_v40  ;;  %v1117_v43 = vadd.f32 %v2105_v62, %v1116_v42  ;;  %v1249_v44 = vpop.f32.mrf.mxu3  ;;  %1705 = vmatmul.msk.bf16.gmra.mxu0 %vm455_vm0, %v1821_v38  ;;  %v857_v58 = vmax.f32 %v616_v46, 0.0 }
 0x18e   : > { %1730 = vmatmul.msk.bf16.gmra.mxu1 %vm455_vm0, %v1821_v38  ;;  %v858_v0 = vmax.f32 %v749_v48, 0.0 }
 0x18f   : > { %v1250_v45 = vadd.f32 %v1249_v44, %v1117_v43 }
 0x191   : > { %v1355_v47 = vmax.f32 %v1250_v45, 0.0 }
 0x192   : > { %v617_v49 = vpop.f32.mrf.mxu0 }
 0x193   : > { %v1404_v51 = vpack.c.bf16 %v1355_v47, %v1355_v47  ;;  %v618_v54 = vadd.f32 %v617_v49, %v2036_v52  ;;  %v750_v55 = vpop.f32.mrf.mxu1 }
 0x194   : > { %v751_v56 = vadd.f32 %v750_v55, %v2039_v53  ;;  %v1118_v57 = vpop.f32.mrf.mxu2 }
 0x195   : > { %1454 = vst.msk [vmem:[%s2118_s28 + $0x30] sm:$0xf] %vm1441_vm1, %v1404_v51  ;;  %v859_v59 = vmax.f32 %v618_v54, 0.0  ;;  %v1119_v60 = vadd.f32 %v2105_v62, %v1118_v57  ;;  %v1251_v61 = vpop.f32.mrf.mxu3 }
 0x196   : > { %v860_v1 = vmax.f32 %v751_v56, 0.0 }
 0x197   : > { %v925_v2 = vpack.c.bf16 %v859_v59, %v857_v58  ;;  %v1252_v3 = vadd.f32 %v1251_v61, %v1119_v60 }
 0x198   : > { %v926_v4 = vpack.c.bf16 %v860_v1, %v858_v0 }
 0x199   : > { %v1356_v5 = vmax.f32 %v1252_v3, 0.0  ;;  %1160 = vmatmul.bf16.gmra.mxu2 %v925_v2 }
 0x19a   : > { %1293 = vmatmul.bf16.gmra.mxu3 %v926_v4  ;;  %v620_v7 = vpop.f32.mrf.mxu0 }
 0x19b   : > { %v1405_v8 = vpack.c.bf16 %v1356_v5, %v1356_v5  ;;  %v753_v9 = vpop.f32.mrf.mxu1  ;;  %v621_v14 = vadd.f32 %v620_v7, %v2036_v52 }
 0x19c   : > { %v1121_v10 = vpop.f32.mrf.mxu2  ;;  %v754_v16 = vadd.f32 %v753_v9, %v2039_v53 }
 0x19d   : > { %1455 = vst.msk [vmem:[%s2118_s28 + $0x34] sm:$0xf] %vm1441_vm1, %v1405_v8  ;;  %v1122_v11 = vadd.f32 %v2105_v62, %v1121_v10  ;;  %v1254_v12 = vpop.f32.mrf.mxu3  ;;  %1706 = vmatmul.msk.bf16.gmra.mxu0 %vm455_vm0, %v414_v6  ;;  %v861_v23 = vmax.f32 %v621_v14, 0.0 }
 0x19e   : > { %1731 = vmatmul.msk.bf16.gmra.mxu1 %vm455_vm0, %v414_v6  ;;  %v862_v27 = vmax.f32 %v754_v16, 0.0 }
 0x19f   : > { %v1255_v13 = vadd.f32 %v1254_v12, %v1122_v11 }
 0x1a1   : > { %v1357_v15 = vmax.f32 %v1255_v13, 0.0 }
 0x1a2   : > { %v622_v17 = vpop.f32.mrf.mxu0 }
 0x1a3   : > { %v1406_v18 = vpack.c.bf16 %v1357_v15, %v1357_v15  ;;  %v623_v19 = vadd.f32 %v622_v17, %v2036_v52  ;;  %v755_v20 = vpop.f32.mrf.mxu1 }
 0x1a4   : > { %v756_v21 = vadd.f32 %v755_v20, %v2039_v53  ;;  %v1123_v22 = vpop.f32.mrf.mxu2 }
 0x1a5   : > { %1456 = vst.msk [vmem:[%s2118_s28 + $0x38] sm:$0xf] %vm1441_vm1, %v1406_v18  ;;  %v863_v24 = vmax.f32 %v623_v19, 0.0  ;;  %v1124_v25 = vadd.f32 %v2105_v62, %v1123_v22  ;;  %v1256_v26 = vpop.f32.mrf.mxu3 }
 0x1a6   : > { %v864_v28 = vmax.f32 %v756_v21, 0.0 }
 0x1a7   : > { %v927_v29 = vpack.c.bf16 %v863_v24, %v861_v23  ;;  %v1257_v30 = vadd.f32 %v1256_v26, %v1124_v25 }
 0x1a8   : > { %v928_v31 = vpack.c.bf16 %v864_v28, %v862_v27 }
 0x1a9   : > { %v1358_v32 = vmax.f32 %v1257_v30, 0.0  ;;  %1165 = vmatmul.bf16.gmra.mxu2 %v927_v29 }
 0x1aa   : > { %1298 = vmatmul.bf16.gmra.mxu3 %v928_v31  ;;  %v625_v33 = vpop.f32.mrf.mxu0 }
 0x1ab   : > { %v1407_v34 = vpack.c.bf16 %v1358_v32, %v1358_v32  ;;  %v758_v35 = vpop.f32.mrf.mxu1  ;;  %v626_v40 = vadd.f32 %v625_v33, %v2036_v52 }
 0x1ac   : > { %v1126_v36 = vpop.f32.mrf.mxu2  ;;  %v759_v42 = vadd.f32 %v758_v35, %v2039_v53 }
 0x1ad   : > { %1457 = vst.msk [vmem:[%s2118_s28 + $0x3c] sm:$0xf] %vm1441_vm1, %v1407_v34  ;;  %v1127_v37 = vadd.f32 %v2105_v62, %v1126_v36  ;;  %v1259_v38 = vpop.f32.mrf.mxu3  ;;  %v865_v49 = vmax.f32 %v626_v40, 0.0 }
 0x1ae   : > { %v866_v55 = vmax.f32 %v759_v42, 0.0 }
 0x1af   : > { %v1260_v39 = vadd.f32 %v1259_v38, %v1127_v37 }
 0x1b1   : > { %v1359_v41 = vmax.f32 %v1260_v39, 0.0 }
 0x1b2   : > { %v627_v43 = vpop.f32.mrf.mxu0 }
 0x1b3   : > { %v1408_v44 = vpack.c.bf16 %v1359_v41, %v1359_v41  ;;  %v628_v45 = vadd.f32 %v627_v43, %v2036_v52  ;;  %v760_v46 = vpop.f32.mrf.mxu1 }
 0x1b4   : > { %v761_v47 = vadd.f32 %v760_v46, %v2039_v53  ;;  %v1128_v48 = vpop.f32.mrf.mxu2 }
 0x1b5   : > { %1458 = vst.msk [vmem:[%s2118_s28 + $0x40] sm:$0xf] %vm1441_vm1, %v1408_v44  ;;  %v867_v50 = vmax.f32 %v628_v45, 0.0  ;;  %v1129_v51 = vadd.f32 %v2105_v62, %v1128_v48  ;;  %v1261_v54 = vpop.f32.mrf.mxu3 }
 0x1b6   : > { %v868_v56 = vmax.f32 %v761_v47, 0.0 }
 0x1b7   : > { %v929_v57 = vpack.c.bf16 %v867_v50, %v865_v49  ;;  %v1262_v58 = vadd.f32 %v1261_v54, %v1129_v51 }
 0x1b8   : > { %v930_v59 = vpack.c.bf16 %v868_v56, %v866_v55 }
 0x1b9   : > { %v1360_v60 = vmax.f32 %v1262_v58, 0.0  ;;  %1170 = vmatmul.bf16.gmra.mxu2 %v929_v57 }
 0x1ba   : > { %1303 = vmatmul.bf16.gmra.mxu3 %v930_v59  ;;  %v630_v61 = vpop.f32.mrf.mxu0 }
 0x1bb   : > { %v1409_v63 = vpack.c.bf16 %v1360_v60, %v1360_v60  ;;  %v763_v0 = vpop.f32.mrf.mxu1  ;;  %v631_v5 = vadd.f32 %v630_v61, %v2036_v52 }
 0x1bc   : > { %v1131_v1 = vpop.f32.mrf.mxu2  ;;  %v764_v7 = vadd.f32 %v763_v0, %v2039_v53 }
 0x1bd   : > { %1459 = vst.msk [vmem:[%s2118_s28 + $0x44] sm:$0xf] %vm1441_vm1, %v1409_v63  ;;  %v1132_v2 = vadd.f32 %v2105_v62, %v1131_v1  ;;  %v1264_v3 = vpop.f32.mrf.mxu3  ;;  %v869_v14 = vmax.f32 %v631_v5, 0.0 }
 0x1be   : > { %v870_v18 = vmax.f32 %v764_v7, 0.0 }
 0x1bf   : > { %v1265_v4 = vadd.f32 %v1264_v3, %v1132_v2 }
 0x1c1   : > { %v1361_v6 = vmax.f32 %v1265_v4, 0.0 }
 0x1c2   : > { %v632_v8 = vpop.f32.mrf.mxu0 }
 0x1c3   : > { %v1410_v9 = vpack.c.bf16 %v1361_v6, %v1361_v6  ;;  %v633_v10 = vadd.f32 %v632_v8, %v2036_v52  ;;  %v765_v11 = vpop.f32.mrf.mxu1 }
 0x1c4   : > { %v766_v12 = vadd.f32 %v765_v11, %v2039_v53  ;;  %v1133_v13 = vpop.f32.mrf.mxu2 }
 0x1c5   : > { %1460 = vst.msk [vmem:[%s2118_s28 + $0x48] sm:$0xf] %vm1441_vm1, %v1410_v9  ;;  %v871_v15 = vmax.f32 %v633_v10, 0.0  ;;  %v1134_v16 = vadd.f32 %v2105_v62, %v1133_v13  ;;  %v1266_v17 = vpop.f32.mrf.mxu3 }
 0x1c6   : > { %v872_v19 = vmax.f32 %v766_v12, 0.0 }
 0x1c7   : > { %v931_v20 = vpack.c.bf16 %v871_v15, %v869_v14  ;;  %v1267_v21 = vadd.f32 %v1266_v17, %v1134_v16 }
 0x1c8   : > { %v932_v22 = vpack.c.bf16 %v872_v19, %v870_v18 }
 0x1c9   : > { %v1362_v23 = vmax.f32 %v1267_v21, 0.0  ;;  %1175 = vmatmul.bf16.gmra.mxu2 %v931_v20 }
 0x1ca   : > { %1308 = vmatmul.bf16.gmra.mxu3 %v932_v22  ;;  %v635_v24 = vpop.f32.mrf.mxu0 }
 0x1cb   : > { %v1411_v25 = vpack.c.bf16 %v1362_v23, %v1362_v23  ;;  %v768_v26 = vpop.f32.mrf.mxu1  ;;  %v636_v31 = vadd.f32 %v635_v24, %v2036_v52 }
 0x1cc   : > { %v1136_v27 = vpop.f32.mrf.mxu2  ;;  %v769_v33 = vadd.f32 %v768_v26, %v2039_v53 }
 0x1cd   : > { %1461 = vst.msk [vmem:[%s2118_s28 + $0x4c] sm:$0xf] %vm1441_vm1, %v1411_v25  ;;  %v1137_v28 = vadd.f32 %v2105_v62, %v1136_v27  ;;  %v1269_v29 = vpop.f32.mrf.mxu3  ;;  %v873_v40 = vmax.f32 %v636_v31, 0.0 }
 0x1ce   : > { %v874_v44 = vmax.f32 %v769_v33, 0.0 }
 0x1cf   : > { %v1270_v30 = vadd.f32 %v1269_v29, %v1137_v28 }
 0x1d1   : > { %v1363_v32 = vmax.f32 %v1270_v30, 0.0 }
 0x1d2   : > { %v637_v34 = vpop.f32.mrf.mxu0 }
 0x1d3   : > { %v1412_v35 = vpack.c.bf16 %v1363_v32, %v1363_v32  ;;  %v638_v36 = vadd.f32 %v637_v34, %v2036_v52  ;;  %v770_v37 = vpop.f32.mrf.mxu1 }
 0x1d4   : > { %v771_v38 = vadd.f32 %v770_v37, %v2039_v53  ;;  %v1138_v39 = vpop.f32.mrf.mxu2 }
 0x1d5   : > { %1462 = vst.msk [vmem:[%s2118_s28 + $0x50] sm:$0xf] %vm1441_vm1, %v1412_v35  ;;  %v875_v41 = vmax.f32 %v638_v36, 0.0  ;;  %v1139_v42 = vadd.f32 %v2105_v62, %v1138_v39  ;;  %v1271_v43 = vpop.f32.mrf.mxu3 }
 0x1d6   : > { %v876_v45 = vmax.f32 %v771_v38, 0.0 }
 0x1d7   : > { %v933_v46 = vpack.c.bf16 %v875_v41, %v873_v40  ;;  %v1272_v47 = vadd.f32 %v1271_v43, %v1139_v42 }
 0x1d8   : > { %v934_v48 = vpack.c.bf16 %v876_v45, %v874_v44 }
 0x1d9   : > { %v1364_v49 = vmax.f32 %v1272_v47, 0.0  ;;  %1180 = vmatmul.bf16.gmra.mxu2 %v933_v46 }
 0x1da   : > { %1313 = vmatmul.bf16.gmra.mxu3 %v934_v48  ;;  %v640_v50 = vpop.f32.mrf.mxu0 }
 0x1db   : > { %v1413_v51 = vpack.c.bf16 %v1364_v49, %v1364_v49  ;;  %v773_v54 = vpop.f32.mrf.mxu1  ;;  %v641_v59 = vadd.f32 %v640_v50, %v2036_v52 }
 0x1dc   : > { %v1141_v55 = vpop.f32.mrf.mxu2  ;;  %v774_v61 = vadd.f32 %v773_v54, %v2039_v53 }
 0x1dd   : > { %1463 = vst.msk [vmem:[%s2118_s28 + $0x54] sm:$0xf] %vm1441_vm1, %v1413_v51  ;;  %v1142_v56 = vadd.f32 %v2105_v62, %v1141_v55  ;;  %v1274_v57 = vpop.f32.mrf.mxu3  ;;  %v877_v5 = vmax.f32 %v641_v59, 0.0 }
 0x1de   : > { %v878_v9 = vmax.f32 %v774_v61, 0.0 }
 0x1df   : > { %v1275_v58 = vadd.f32 %v1274_v57, %v1142_v56 }
 0x1e1   : > { %v1365_v60 = vmax.f32 %v1275_v58, 0.0 }
 0x1e2   : > { %v642_v63 = vpop.f32.mrf.mxu0 }
 0x1e3   : > { %v1414_v0 = vpack.c.bf16 %v1365_v60, %v1365_v60  ;;  %v643_v1 = vadd.f32 %v642_v63, %v2036_v52  ;;  %v775_v2 = vpop.f32.mrf.mxu1 }
 0x1e4   : > { %v776_v3 = vadd.f32 %v775_v2, %v2039_v53  ;;  %v1143_v4 = vpop.f32.mrf.mxu2 }
 0x1e5   : > { %1464 = vst.msk [vmem:[%s2118_s28 + $0x58] sm:$0xf] %vm1441_vm1, %v1414_v0  ;;  %v879_v6 = vmax.f32 %v643_v1, 0.0  ;;  %v1144_v7 = vadd.f32 %v2105_v62, %v1143_v4  ;;  %v1276_v8 = vpop.f32.mrf.mxu3 }
 0x1e6   : > { %v880_v10 = vmax.f32 %v776_v3, 0.0 }
 0x1e7   : > { %v935_v11 = vpack.c.bf16 %v879_v6, %v877_v5  ;;  %v1277_v12 = vadd.f32 %v1276_v8, %v1144_v7 }
 0x1e8   : > { %v936_v13 = vpack.c.bf16 %v880_v10, %v878_v9 }
 0x1e9   : > { %v1366_v14 = vmax.f32 %v1277_v12, 0.0  ;;  %1185 = vmatmul.bf16.gmra.mxu2 %v935_v11 }
 0x1ea   : > { %1318 = vmatmul.bf16.gmra.mxu3 %v936_v13  ;;  %v645_v15 = vpop.f32.mrf.mxu0 }
 0x1eb   : > { %v1415_v16 = vpack.c.bf16 %v1366_v14, %v1366_v14  ;;  %v778_v17 = vpop.f32.mrf.mxu1  ;;  %v646_v22 = vadd.f32 %v645_v15, %v2036_v52 }
 0x1ec   : > { %v1146_v18 = vpop.f32.mrf.mxu2  ;;  %v779_v24 = vadd.f32 %v778_v17, %v2039_v53 }
 0x1ed   : > { %1465 = vst.msk [vmem:[%s2118_s28 + $0x5c] sm:$0xf] %vm1441_vm1, %v1415_v16  ;;  %v1147_v19 = vadd.f32 %v2105_v62, %v1146_v18  ;;  %v1279_v20 = vpop.f32.mrf.mxu3  ;;  %v881_v31 = vmax.f32 %v646_v22, 0.0 }
 0x1ee   : > { %v882_v35 = vmax.f32 %v779_v24, 0.0 }
 0x1ef   : > { %v1280_v21 = vadd.f32 %v1279_v20, %v1147_v19 }
 0x1f1   : > { %v1367_v23 = vmax.f32 %v1280_v21, 0.0 }
 0x1f2   : > { %v647_v25 = vpop.f32.mrf.mxu0 }
 0x1f3   : > { %v1416_v26 = vpack.c.bf16 %v1367_v23, %v1367_v23  ;;  %v648_v27 = vadd.f32 %v647_v25, %v2036_v52  ;;  %v780_v28 = vpop.f32.mrf.mxu1 }
 0x1f4   : > { %v781_v29 = vadd.f32 %v780_v28, %v2039_v53  ;;  %v1148_v30 = vpop.f32.mrf.mxu2 }
 0x1f5   : > { %1466 = vst.msk [vmem:[%s2118_s28 + $0x60] sm:$0xf] %vm1441_vm1, %v1416_v26  ;;  %v883_v32 = vmax.f32 %v648_v27, 0.0  ;;  %v1149_v33 = vadd.f32 %v2105_v62, %v1148_v30  ;;  %v1281_v34 = vpop.f32.mrf.mxu3 }
 0x1f6   : > { %v884_v36 = vmax.f32 %v781_v29, 0.0 }
 0x1f7   : > { %v937_v37 = vpack.c.bf16 %v883_v32, %v881_v31  ;;  %v1282_v38 = vadd.f32 %v1281_v34, %v1149_v33 }
 0x1f8   : > { %v938_v39 = vpack.c.bf16 %v884_v36, %v882_v35 }
 0x1f9   : > { %v1368_v40 = vmax.f32 %v1282_v38, 0.0  ;;  %1190 = vmatmul.bf16.gmra.mxu2 %v937_v37 }
 0x1fa   : > { %1323 = vmatmul.bf16.gmra.mxu3 %v938_v39  ;;  %v650_v41 = vpop.f32.mrf.mxu0 }
 0x1fb   : > { %v1417_v42 = vpack.c.bf16 %v1368_v40, %v1368_v40  ;;  %v783_v43 = vpop.f32.mrf.mxu1  ;;  %v651_v48 = vadd.f32 %v650_v41, %v2036_v52 }
 0x1fc   : > { %v1151_v44 = vpop.f32.mrf.mxu2  ;;  %v784_v50 = vadd.f32 %v783_v43, %v2039_v53 }
 0x1fd   : > { %1467 = vst.msk [vmem:[%s2118_s28 + $0x64] sm:$0xf] %vm1441_vm1, %v1417_v42  ;;  %v1152_v45 = vadd.f32 %v2105_v62, %v1151_v44  ;;  %v1284_v46 = vpop.f32.mrf.mxu3  ;;  %v885_v59 = vmax.f32 %v651_v48, 0.0 }
 0x1fe   : > { %v886_v0 = vmax.f32 %v784_v50, 0.0 }
 0x1ff   : > { %v1285_v47 = vadd.f32 %v1284_v46, %v1152_v45 }
 0x201   : > { %v1369_v49 = vmax.f32 %v1285_v47, 0.0 }
 0x202   : > { %v652_v51 = vpop.f32.mrf.mxu0 }
 0x203   : > { %v1418_v54 = vpack.c.bf16 %v1369_v49, %v1369_v49  ;;  %v653_v55 = vadd.f32 %v652_v51, %v2036_v52  ;;  %v785_v56 = vpop.f32.mrf.mxu1 }
 0x204   : > { %v786_v57 = vadd.f32 %v785_v56, %v2039_v53  ;;  %v1153_v58 = vpop.f32.mrf.mxu2 }
 0x205   : > { %1468 = vst.msk [vmem:[%s2118_s28 + $0x68] sm:$0xf] %vm1441_vm1, %v1418_v54  ;;  %v887_v60 = vmax.f32 %v653_v55, 0.0  ;;  %v1154_v61 = vadd.f32 %v2105_v62, %v1153_v58  ;;  %v1286_v63 = vpop.f32.mrf.mxu3 }
 0x206   : > { %v888_v1 = vmax.f32 %v786_v57, 0.0 }
 0x207   : > { %v939_v2 = vpack.c.bf16 %v887_v60, %v885_v59  ;;  %v1287_v3 = vadd.f32 %v1286_v63, %v1154_v61  ;;  %v2302_v63 = vld [vmem:[%s2359_s4] ss:$0 sm:$0xff] }
 0x208   : > { %v940_v4 = vpack.c.bf16 %v888_v1, %v886_v0 }
 0x209   : > { %v1370_v5 = vmax.f32 %v1287_v3, 0.0  ;;  %1195 = vmatmul.bf16.gmra.mxu2 %v939_v2 }
 0x20a   : > { %1328 = vmatmul.bf16.gmra.mxu3 %v940_v4  ;;  %v655_v6 = vpop.f32.mrf.mxu0 }
 0x20b   : > { %v1419_v7 = vpack.c.bf16 %v1370_v5, %v1370_v5  ;;  %v788_v8 = vpop.f32.mrf.mxu1  ;;  %v656_v13 = vadd.f32 %v655_v6, %v2036_v52 }
 0x20c   : > { %v1156_v9 = vpop.f32.mrf.mxu2  ;;  %v789_v15 = vadd.f32 %v788_v8, %v2039_v53 }
 0x20d   : > { %1469 = vst.msk [vmem:[%s2118_s28 + $0x6c] sm:$0xf] %vm1441_vm1, %v1419_v7  ;;  %v1157_v10 = vadd.f32 %v2105_v62, %v1156_v9  ;;  %v1289_v11 = vpop.f32.mrf.mxu3  ;;  %v889_v22 = vmax.f32 %v656_v13, 0.0 }
 0x20e   : > { %v890_v26 = vmax.f32 %v789_v15, 0.0 }
 0x20f   : > { %v1290_v12 = vadd.f32 %v1289_v11, %v1157_v10 }
 0x211   : > { %v1371_v14 = vmax.f32 %v1290_v12, 0.0 }
 0x212   : > { %v657_v16 = vpop.f32.mrf.mxu0 }
 0x213   : > { %v1420_v17 = vpack.c.bf16 %v1371_v14, %v1371_v14  ;;  %v658_v18 = vadd.f32 %v657_v16, %v2036_v52  ;;  %v790_v19 = vpop.f32.mrf.mxu1 }
 0x214   : > { %v791_v20 = vadd.f32 %v790_v19, %v2039_v53  ;;  %v1158_v21 = vpop.f32.mrf.mxu2 }
 0x215   : > { %1470 = vst.msk [vmem:[%s2118_s28 + $0x70] sm:$0xf] %vm1441_vm1, %v1420_v17  ;;  %v891_v23 = vmax.f32 %v658_v18, 0.0  ;;  %v1159_v24 = vadd.f32 %v2105_v62, %v1158_v21  ;;  %v1291_v25 = vpop.f32.mrf.mxu3 }
 0x216   : > { %v892_v27 = vmax.f32 %v791_v20, 0.0 }
 0x217   : > { %v941_v28 = vpack.c.bf16 %v891_v23, %v889_v22  ;;  %v1292_v29 = vadd.f32 %v1291_v25, %v1159_v24 }
 0x218   : > { %v942_v30 = vpack.c.bf16 %v892_v27, %v890_v26 }
 0x219   : > { %v1372_v31 = vmax.f32 %v1292_v29, 0.0  ;;  %1200 = vmatmul.bf16.gmra.mxu2 %v941_v28 }
 0x21a   : > { %1333 = vmatmul.bf16.gmra.mxu3 %v942_v30  ;;  %v660_v32 = vpop.f32.mrf.mxu0 }
 0x21b   : > { %v1421_v33 = vpack.c.bf16 %v1372_v31, %v1372_v31  ;;  %v793_v34 = vpop.f32.mrf.mxu1  ;;  %v661_v36 = vadd.f32 %v660_v32, %v2036_v52 }
 0x21c   : > { %v1161_v35 = vpop.f32.mrf.mxu2  ;;  %v794_v39 = vadd.f32 %v793_v34, %v2039_v53 }
 0x21d   : > { %1471 = vst.msk [vmem:[%s2118_s28 + $0x74] sm:$0xf] %vm1441_vm1, %v1421_v33  ;;  %v1162_v37 = vadd.f32 %v2105_v62, %v1161_v35  ;;  %v1294_v38 = vpop.f32.mrf.mxu3  ;;  %v893_v41 = vmax.f32 %v661_v36, 0.0 }
 0x21e   : > { %v894_v43 = vmax.f32 %v794_v39, 0.0 }
 0x21f   : > { %v1295_v40 = vadd.f32 %v1294_v38, %v1162_v37  ;;  %v943_v48 = vpack.c.bf16 %v893_v41, %v893_v41 }
 0x220   : > { %v944_v50 = vpack.c.bf16 %v894_v43, %v894_v43 }
 0x221   : > { %v1373_v42 = vmax.f32 %v1295_v40, 0.0 }
 0x222   : > { %v662_v44 = vpop.f32.mrf.mxu0 }
 0x223   : > { %v1422_v45 = vpack.c.bf16 %v1373_v42, %v1373_v42  ;;  %v795_v46 = vpop.f32.mrf.mxu1 }
 0x224   : > { %v1163_v47 = vpop.f32.mrf.mxu2 }
 0x225   : > { %1472 = vst.msk [vmem:[%s2118_s28 + $0x78] sm:$0xf] %vm1441_vm1, %v1422_v45  ;;  %v1164_v49 = vadd.f32 %v2105_v62, %v1163_v47  ;;  %v1296_v52 = vpop.f32.mrf.mxu3 }
 0x227   : > { %v1297_v51 = vadd.f32 %v1296_v52, %v1164_v49 }
 0x229   : > { %v1374_v54 = vmax.f32 %v1297_v51, 0.0  ;;  %1205 = vmatmul.bf16.gmra.mxu2 %v943_v48 }
 0x22a   : > { %1338 = vmatmul.bf16.gmra.mxu3 %v944_v50 }
 0x22b   : > { %v1423_v53 = vpack.c.bf16 %v1374_v54, %v1374_v54 }
 0x22c   : > { %v1166_v55 = vpop.f32.mrf.mxu2 }
 0x22d   : > { %1473 = vst.msk [vmem:[%s2118_s28 + $0x7c] sm:$0xf] %vm1441_vm1, %v1423_v53  ;;  %v1167_v56 = vadd.f32 %v2105_v62, %v1166_v55  ;;  %v1299_v57 = vpop.f32.mrf.mxu3 }
 0x22f   : > { %v1300_v58 = vadd.f32 %v1299_v57, %v1167_v56 }
 0x231   : > { %v1375_v59 = vmax.f32 %v1300_v58, 0.0 }
 0x233   : > { %v1424_v60 = vpack.c.bf16 %v1375_v59, %v1375_v59 }
 0x234   : > { %v1168_v61 = vpop.f32.mrf.mxu2 }
 0x235   : > { %1474 = vst.msk [vmem:[%s2118_s28 + $0x80] sm:$0xf] %vm1441_vm1, %v1424_v60  ;;  %v1169_v0 = vadd.f32 %v2302_v63, %v1168_v61  ;;  %v1301_v1 = vpop.f32.mrf.mxu3 }
 0x237   : > { %v1302_v2 = vadd.f32 %v1301_v1, %v1169_v0 }
 0x239   : > { %v1376_v3 = vmax.f32 %v1302_v2, 0.0 }
 0x23b   : > { %v1425_v4 = vpack.c.bf16 %v1376_v3, %v1376_v3 }
 0x23c   : > { %v1171_v62 = vpop.f32.mrf.mxu2 }
 0x23d   : > { %1475 = vst.msk [vmem:[%s2118_s28 + $0x84] sm:$0xf] %vm1441_vm1, %v1425_v4  ;;  %v1172_v5 = vadd.f32 %v2302_v63, %v1171_v62  ;;  %v1304_v6 = vpop.f32.mrf.mxu3 }
 0x23f   : > { %v1305_v7 = vadd.f32 %v1304_v6, %v1172_v5 }
 0x241   : > { %v1377_v8 = vmax.f32 %v1305_v7, 0.0 }
 0x243   : > { %v1426_v9 = vpack.c.bf16 %v1377_v8, %v1377_v8 }
 0x244   : > { %v1173_v10 = vpop.f32.mrf.mxu2 }
 0x245   : > { %1476 = vst.msk [vmem:[%s2118_s28 + $0x88] sm:$0xf] %vm1441_vm1, %v1426_v9  ;;  %v1174_v11 = vadd.f32 %v2302_v63, %v1173_v10  ;;  %v1306_v12 = vpop.f32.mrf.mxu3 }
 0x247   : > { %v1307_v13 = vadd.f32 %v1306_v12, %v1174_v11 }
 0x249   : > { %v1378_v14 = vmax.f32 %v1307_v13, 0.0 }
 0x24b   : > { %v1427_v15 = vpack.c.bf16 %v1378_v14, %v1378_v14 }
 0x24c   : > { %v1176_v16 = vpop.f32.mrf.mxu2 }
 0x24d   : > { %1477 = vst.msk [vmem:[%s2118_s28 + $0x8c] sm:$0xf] %vm1441_vm1, %v1427_v15  ;;  %v1177_v17 = vadd.f32 %v2302_v63, %v1176_v16  ;;  %v1309_v18 = vpop.f32.mrf.mxu3 }
 0x24f   : > { %v1310_v19 = vadd.f32 %v1309_v18, %v1177_v17 }
 0x251   : > { %v1379_v20 = vmax.f32 %v1310_v19, 0.0 }
 0x253   : > { %v1428_v21 = vpack.c.bf16 %v1379_v20, %v1379_v20 }
 0x254   : > { %v1178_v22 = vpop.f32.mrf.mxu2 }
 0x255   : > { %1478 = vst.msk [vmem:[%s2118_s28 + $0x90] sm:$0xf] %vm1441_vm1, %v1428_v21  ;;  %v1179_v23 = vadd.f32 %v2302_v63, %v1178_v22  ;;  %v1311_v24 = vpop.f32.mrf.mxu3 }
 0x257   : > { %v1312_v25 = vadd.f32 %v1311_v24, %v1179_v23 }
 0x259   : > { %v1380_v26 = vmax.f32 %v1312_v25, 0.0 }
 0x25b   : > { %v1429_v27 = vpack.c.bf16 %v1380_v26, %v1380_v26 }
 0x25c   : > { %v1181_v28 = vpop.f32.mrf.mxu2 }
 0x25d   : > { %1479 = vst.msk [vmem:[%s2118_s28 + $0x94] sm:$0xf] %vm1441_vm1, %v1429_v27  ;;  %v1182_v29 = vadd.f32 %v2302_v63, %v1181_v28  ;;  %v1314_v30 = vpop.f32.mrf.mxu3 }
 0x25f   : > { %v1315_v31 = vadd.f32 %v1314_v30, %v1182_v29 }
 0x261   : > { %v1381_v32 = vmax.f32 %v1315_v31, 0.0 }
 0x263   : > { %v1430_v33 = vpack.c.bf16 %v1381_v32, %v1381_v32 }
 0x264   : > { %v1183_v34 = vpop.f32.mrf.mxu2 }
 0x265   : > { %1480 = vst.msk [vmem:[%s2118_s28 + $0x98] sm:$0xf] %vm1441_vm1, %v1430_v33  ;;  %v1184_v35 = vadd.f32 %v2302_v63, %v1183_v34  ;;  %v1316_v36 = vpop.f32.mrf.mxu3 }
 0x267   : > { %v1317_v37 = vadd.f32 %v1316_v36, %v1184_v35 }
 0x269   : > { %v1382_v38 = vmax.f32 %v1317_v37, 0.0 }
 0x26b   : > { %v1431_v39 = vpack.c.bf16 %v1382_v38, %v1382_v38 }
 0x26c   : > { %v1186_v40 = vpop.f32.mrf.mxu2 }
 0x26d   : > { %1481 = vst.msk [vmem:[%s2118_s28 + $0x9c] sm:$0xf] %vm1441_vm1, %v1431_v39  ;;  %v1187_v41 = vadd.f32 %v2302_v63, %v1186_v40  ;;  %v1319_v42 = vpop.f32.mrf.mxu3 }
 0x26f   : > { %v1320_v43 = vadd.f32 %v1319_v42, %v1187_v41 }
 0x271   : > { %v1383_v44 = vmax.f32 %v1320_v43, 0.0 }
 0x273   : > { %v1432_v45 = vpack.c.bf16 %v1383_v44, %v1383_v44 }
 0x274   : > { %v1188_v46 = vpop.f32.mrf.mxu2 }
 0x275   : > { %1482 = vst.msk [vmem:[%s2118_s28 + $0xa0] sm:$0xf] %vm1441_vm1, %v1432_v45  ;;  %v1189_v47 = vadd.f32 %v2302_v63, %v1188_v46  ;;  %v1321_v48 = vpop.f32.mrf.mxu3 }
 0x277   : > { %v1322_v49 = vadd.f32 %v1321_v48, %v1189_v47 }
 0x279   : > { %v1384_v52 = vmax.f32 %v1322_v49, 0.0 }
 0x27b   : > { %v1433_v50 = vpack.c.bf16 %v1384_v52, %v1384_v52 }
 0x27c   : > { %v1191_v51 = vpop.f32.mrf.mxu2 }
 0x27d   : > { %1483 = vst.msk [vmem:[%s2118_s28 + $0xa4] sm:$0xf] %vm1441_vm1, %v1433_v50  ;;  %v1192_v54 = vadd.f32 %v2302_v63, %v1191_v51  ;;  %v1324_v53 = vpop.f32.mrf.mxu3 }
 0x27f   : > { %v1325_v55 = vadd.f32 %v1324_v53, %v1192_v54 }
 0x281   : > { %v1385_v56 = vmax.f32 %v1325_v55, 0.0 }
 0x283   : > { %v1434_v57 = vpack.c.bf16 %v1385_v56, %v1385_v56 }
 0x284   : > { %v1193_v58 = vpop.f32.mrf.mxu2 }
 0x285   : > { %1484 = vst.msk [vmem:[%s2118_s28 + $0xa8] sm:$0xf] %vm1441_vm1, %v1434_v57  ;;  %v1194_v59 = vadd.f32 %v2302_v63, %v1193_v58  ;;  %v1326_v60 = vpop.f32.mrf.mxu3 }
 0x287   : > { %v1327_v61 = vadd.f32 %v1326_v60, %v1194_v59 }
 0x289   : > { %v1386_v0 = vmax.f32 %v1327_v61, 0.0 }
 0x28b   : > { %v1435_v1 = vpack.c.bf16 %v1386_v0, %v1386_v0 }
 0x28c   : > { %v1196_v2 = vpop.f32.mrf.mxu2 }
 0x28d   : > { %1485 = vst.msk [vmem:[%s2118_s28 + $0xac] sm:$0xf] %vm1441_vm1, %v1435_v1  ;;  %v1197_v3 = vadd.f32 %v2302_v63, %v1196_v2  ;;  %v1329_v4 = vpop.f32.mrf.mxu3 }
 0x28f   : > { %v1330_v62 = vadd.f32 %v1329_v4, %v1197_v3 }
 0x291   : > { %v1387_v5 = vmax.f32 %v1330_v62, 0.0 }
 0x293   : > { %v1436_v6 = vpack.c.bf16 %v1387_v5, %v1387_v5 }
 0x294   : > { %v1198_v7 = vpop.f32.mrf.mxu2 }
 0x295   : > { %1486 = vst.msk [vmem:[%s2118_s28 + $0xb0] sm:$0xf] %vm1441_vm1, %v1436_v6  ;;  %v1199_v8 = vadd.f32 %v2302_v63, %v1198_v7  ;;  %v1331_v9 = vpop.f32.mrf.mxu3 }
 0x297   : > { %v1332_v10 = vadd.f32 %v1331_v9, %v1199_v8 }
 0x299   : > { %v1388_v11 = vmax.f32 %v1332_v10, 0.0 }
 0x29b   : > { %v1437_v12 = vpack.c.bf16 %v1388_v11, %v1388_v11 }
 0x29c   : > { %v1201_v13 = vpop.f32.mrf.mxu2 }
 0x29d   : > { %1487 = vst.msk [vmem:[%s2118_s28 + $0xb4] sm:$0xf] %vm1441_vm1, %v1437_v12  ;;  %v1202_v14 = vadd.f32 %v2302_v63, %v1201_v13  ;;  %v1334_v15 = vpop.f32.mrf.mxu3 }
 0x29f   : > { %v1335_v16 = vadd.f32 %v1334_v15, %v1202_v14 }
 0x2a1   : > { %v1389_v17 = vmax.f32 %v1335_v16, 0.0 }
 0x2a3   : > { %v1438_v18 = vpack.c.bf16 %v1389_v17, %v1389_v17 }
 0x2a4   : > { %v1203_v19 = vpop.f32.mrf.mxu2 }
 0x2a5   : > { %1488 = vst.msk [vmem:[%s2118_s28 + $0xb8] sm:$0xf] %vm1441_vm1, %v1438_v18  ;;  %v1204_v20 = vadd.f32 %v2302_v63, %v1203_v19  ;;  %v1336_v21 = vpop.f32.mrf.mxu3 }
 0x2a7   : > { %v1337_v22 = vadd.f32 %v1336_v21, %v1204_v20 }
 0x2a9   : > { %v1390_v23 = vmax.f32 %v1337_v22, 0.0 }
 0x2ab   : > { %v1439_v24 = vpack.c.bf16 %v1390_v23, %v1390_v23 }
 0x2ac   : > { %v1206_v25 = vpop.f32.mrf.mxu2 }
 0x2ad   : > { %1489 = vst.msk [vmem:[%s2118_s28 + $0xbc] sm:$0xf] %vm1441_vm1, %v1439_v24  ;;  %v1207_v26 = vadd.f32 %v2302_v63, %v1206_v25  ;;  %v1339_v27 = vpop.f32.mrf.mxu3 }
 0x2af   : > { %v1340_v28 = vadd.f32 %v1339_v27, %v1207_v26 }
 0x2b1   : > { %v1391_v29 = vmax.f32 %v1340_v28, 0.0 }
 0x2b3   : > { %v1440_v30 = vpack.c.bf16 %v1391_v29, %v1391_v29 }
 0x2b4   : > { %v1208_v31 = vpop.f32.mrf.mxu2 }
 0x2b5   : > { %1490 = vst.msk [vmem:[%s2118_s28 + $0xc0] sm:$0xf] %vm1441_vm1, %v1440_v30  ;;  %v1341_v32 = vpop.f32.mrf.mxu3 }
 0x2b6 PF: > { %s15_s18 = sadd.s32 1, %s1862_s18  }
 0x2b7   : > { %p12_p4 = scmp.ge.s32.totalorder %s15_s18, 4  }
 0x2b9   :  { %14 = sbr.rel (!%p12_p4) target bundleno = 1 (0x1), region = 70 }

</bundles_post_ra>
